<compile_context>
chip_gen: v7x
topology: tpu7x:2x2x1
jax: 0.10.0
libtpu: 0.0.40
codegen_flags: <defaults>
</compile_context>

<pallas_src>
import jax
import jax.numpy as jnp
from jax.experimental import pallas as pl
from jax.experimental.pallas import tpu as pltpu


def _upsample_conv_kernel(xm_ref, xh_ref, w_ref, b_ref, o_ref, xbuf_ref):
    # xm_ref : (1, TH, W+2, Cin)   row tile of the 1-px-padded input
    # xh_ref : (1, 2,  W+2, Cin)   2-row bottom halo of that tile
    # w_ref  : (16, Cin, TC)       phase-folded weights, flat index 8p+4q+2r+s
    # b_ref  : (1, TC)             f32 bias
    # o_ref  : (1, 4, TH, W, TC)   4 output parities (pq = 2p+q), dense slabs
    # xbuf_ref: (TH+2, W+2, Cin)   VMEM staging buffer for tile + halo
    TH = xm_ref.shape[1]
    Cin = xm_ref.shape[3]
    W = o_ref.shape[3]
    TC = o_ref.shape[4]

    # Stage main rows + 2 halo rows contiguously in VMEM.
    xbuf_ref[0:TH] = xm_ref[0]
    xbuf_ref[TH:TH + 2] = xh_ref[0]

    # Hoist the 3 column-shifted slabs once per tile (3 sublane-shift loads
    # total, instead of one relayout copy per tap).
    x_col = [xbuf_ref[:, s:s + W, :] for s in range(3)]    # each (TH+2, W, Cin)

    bias_row = b_ref[...].astype(jnp.float32)              # (1, TC)

    # 4 sub-pixel phases, each a 2x2 conv on the original-resolution input:
    # 16 MXU matmuls, but only 9 distinct LHS slabs (built once each).
    accs = [[jnp.zeros((TH * W, TC), jnp.float32) for _ in range(2)]
            for _ in range(2)]
    for rr in range(3):            # source row shift  (= p + r)
        for cc in range(3):        # source col shift  (= q + s)
            lhs = x_col[cc][rr:rr + TH].reshape(TH * W, Cin)
            for p in range(2):
                r = rr - p
                if r < 0 or r > 1:
                    continue
                for q in range(2):
                    s = cc - q
                    if s < 0 or s > 1:
                        continue
                    w_tap = w_ref[8 * p + 4 * q + 2 * r + s]     # (Cin, TC)
                    accs[p][q] = accs[p][q] + jnp.dot(
                        lhs, w_tap, preferred_element_type=jnp.float32)

    for p in range(2):
        for q in range(2):
            res = accs[p][q] + bias_row
            o_ref[0, 2 * p + q] = res.reshape(TH, W, TC).astype(o_ref.dtype)


def _pick_row_tile(H):
    # 8/16-row tiles keep blocks at a few hundred KiB and give >=2 grid steps
    # along the row axis for pipelining / megacore sharding.
    for th in (16, 8, 4, 2):
        if H % th == 0 and H // th >= 2:
            return th
    # TODO(synk): odd H would need 1-row halo specs; not needed for LDM shapes.
    assert H % 2 == 0, "odd spatial size not supported"
    return H


def _pick_cout_tile(Cout):
    # Tile Cout so the (16, Cin, TC) phase-weight slab stays small enough that
    # the double-buffered blocks fit the default scoped VMEM on all chips.
    if Cout % 128 == 0 and Cout > 256:
        return 256 if Cout % 256 == 0 else 128
    return Cout   # small / non-128-multiple Cout: full dim (always legal)


def _fold_phase_weights(weight_oihw):
    """OIHW 3x3 conv weight -> phase-folded (16, Cin, Cout) weight.

    Flat index is 8p + 4q + 2r + s for output parity (p, q) and 2x2 tap (r, s).
    """
    w = jnp.transpose(weight_oihw, (2, 3, 1, 0)).astype(jnp.float32)  # (3,3,Ci,Co)
    # rows: parity p=0 reads x[i-1], x[i];  p=1 reads x[i], x[i+1]
    a0 = jnp.stack([w[0], w[1] + w[2]], axis=0)                 # (2r, 3, Ci, Co)
    a1 = jnp.stack([w[0] + w[1], w[2]], axis=0)
    a = jnp.stack([a0, a1], axis=0)                             # (2p, 2r, 3, Ci, Co)
    # columns: parity q=0 reads x[j-1], x[j];  q=1 reads x[j], x[j+1]
    b0 = jnp.stack([a[:, :, 0], a[:, :, 1] + a[:, :, 2]], axis=2)
    b1 = jnp.stack([a[:, :, 0] + a[:, :, 1], a[:, :, 2]], axis=2)
    wph = jnp.stack([b0, b1], axis=1)                           # (2p,2q,2r,2s,Ci,Co)
    Cout, Cin = weight_oihw.shape[0], weight_oihw.shape[1]
    return wph.reshape(16, Cin, Cout)


def upsample_forward(x_nchw, weight_oihw, bias, *, compute_dtype=jnp.bfloat16):
    """Upsample.forward (dims=2): nearest 2x upsample + conv3x3(pad=1).

    x_nchw:      (B, Cin, H, W)
    weight_oihw: (Cout, Cin, 3, 3)  PyTorch conv weight layout
    bias:        (Cout,)
    returns:     (B, Cout, 2H, 2W), dtype of x_nchw
    """
    B, Cin, H, W = x_nchw.shape
    Cout = weight_oihw.shape[0]
    out_dtype = x_nchw.dtype

    TH = _pick_row_tile(H)
    TC = _pick_cout_tile(Cout)
    nT, nC = H // TH, Cout // TC

    # Layout glue (one fused pass, ORIGINAL resolution only -- the upsample is
    # folded into the weights): NCHW -> NHWC, 1-px zero pad, cast to MXU dtype.
    # In a full model keep activations NHWC / weights pre-folded across calls.
    x = jnp.transpose(x_nchw, (0, 2, 3, 1))
    xp = jnp.pad(x, ((0, 0), (1, 1), (1, 1), (0, 0))).astype(compute_dtype)
    wph = _fold_phase_weights(weight_oihw).astype(compute_dtype)   # (16,Cin,Cout)
    b2 = bias.reshape(1, Cout).astype(jnp.float32)

    Wp = W + 2

    out5 = pl.pallas_call(
        _upsample_conv_kernel,
        out_shape=jax.ShapeDtypeStruct((B, 4, H, W, Cout), out_dtype),
        grid_spec=pltpu.PrefetchScalarGridSpec(
            num_scalar_prefetch=0,
            grid=(B, nC, nT),   # row tiles innermost -> weight tile stays resident
            in_specs=[
                # main TH rows of the padded input
                pl.BlockSpec((1, TH, Wp, Cin), lambda b, c, t: (b, t, 0, 0)),
                # 2-row bottom halo (same array, second spec -> no block overlap)
                pl.BlockSpec((1, 2, Wp, Cin),
                             lambda b, c, t: (b, (t + 1) * (TH // 2), 0, 0)),
                # phase-folded weights, Cout-tiled
                pl.BlockSpec((16, Cin, TC), lambda b, c, t: (0, 0, c)),
                pl.BlockSpec((1, TC), lambda b, c, t: (0, c)),
            ],
            out_specs=pl.BlockSpec((1, 4, TH, W, TC),
                                   lambda b, c, t: (b, 0, t, 0, c)),
            scratch_shapes=[pltpu.VMEM((TH + 2, Wp, Cin), compute_dtype)],
        ),
        compiler_params=pltpu.CompilerParams(
            # All axes are independent. Tiles are sized to fit the default
            # scoped VMEM with double buffering (raise vmem_limit_bytes here
            # only if larger tiles are ever used).
            dimension_semantics=("parallel", "parallel", "parallel"),
        ),
    )(xp, xp, wph, b2)

    # out5[b, 2p+q, i, j, c] = y[b, 2i+p, 2j+q, c].  The parity interleave is
    # fused into the NHWC->NCHW transpose that is needed anyway.
    out6 = out5.reshape(B, 2, 2, H, W, Cout)
    return jnp.transpose(out6, (0, 5, 3, 1, 4, 2)).reshape(B, Cout, 2 * H, 2 * W)


if __name__ == "__main__":
    key = jax.random.PRNGKey(0)
    k_x, k_w, k_b = jax.random.split(key, 3)

    B, C, H, W = 2, 4, 16, 16
    Cout = C  # out_channels defaults to channels

    x = jax.random.normal(k_x, (B, C, H, W), dtype=jnp.float32)
    weight = 0.1 * jax.random.normal(k_w, (Cout, C, 3, 3), dtype=jnp.float32)
    bias = 0.1 * jax.random.normal(k_b, (Cout,), dtype=jnp.float32)

    # Reference: nearest 2x upsample + conv3x3 pad=1 with XLA conv (NCHW/OIHW).
    x_up = jnp.repeat(jnp.repeat(x, 2, axis=2), 2, axis=3)
    ref = jax.lax.conv_general_dilated(
        x_up, weight, window_strides=(1, 1), padding=((1, 1), (1, 1)),
        dimension_numbers=("NCHW", "OIHW", "NCHW"),
    ) + bias.reshape(1, Cout, 1, 1)

    fwd = jax.jit(upsample_forward, static_argnames=("compute_dtype",))

    # f32 path: tight check of the phase-decomposition math.
    out_f32 = jax.block_until_ready(fwd(x, weight, bias, compute_dtype=jnp.float32))
    assert out_f32.shape == (B, Cout, 2 * H, 2 * W)
    assert jnp.allclose(out_f32, ref, atol=1e-4, rtol=1e-4)

    # bf16 MXU path (production path on v6e/v7x): loose tolerance for bf16
    # rounding of activations / pre-summed weights.
    out_bf16 = jax.block_until_ready(fwd(x, weight, bias, compute_dtype=jnp.bfloat16))
    assert out_bf16.shape == (B, Cout, 2 * H, 2 * W)
    assert jnp.allclose(out_bf16, ref, atol=3e-2, rtol=3e-2)

    print("KERNEL_OK")
</pallas_src>

<mosaic_0001>
module attributes {stable_mosaic.version = 11 : i64} {
  func.func @_upsample_conv_kernel(%arg0: i32, %arg1: i32, %arg2: i32, %arg3: memref<1x8x18x4xf32, #tpu.memory_space<vmem>>, %arg4: memref<1x2x18x4xf32, #tpu.memory_space<vmem>>, %arg5: memref<16x4x4xf32, #tpu.memory_space<vmem>>, %arg6: memref<1x4xf32, #tpu.memory_space<vmem>>, %arg7: memref<1x4x8x16x4xf32, #tpu.memory_space<vmem>>, %arg8: memref<10x18x4xf32, #tpu.memory_space<vmem>>) attributes {dimension_semantics = [#tpu.dimension_semantics<parallel>, #tpu.dimension_semantics<parallel>, #tpu.dimension_semantics<parallel>], iteration_bounds = array<i64: 2, 1, 2>, scalar_prefetch = 0 : i64, scratch_operands = 1 : i64, tpu.core_type = #tpu.core_type<tc>, window_params = [{transform_indices = @transform_0, window_bounds = array<i64: 1, 8, 18, 4>}, {transform_indices = @transform_1, window_bounds = array<i64: 1, 2, 18, 4>}, {transform_indices = @transform_2, window_bounds = array<i64: 16, 4, 4>}, {transform_indices = @transform_3, window_bounds = array<i64: 1, 4>}, {transform_indices = @transform_4, window_bounds = array<i64: 1, 4, 8, 16, 4>}]} {
    %c0 = arith.constant 0 : index
    %c0_0 = arith.constant 0 : index
    %c0_1 = arith.constant 0 : index
    %c0_2 = arith.constant 0 : index
    %0 = vector.load %arg3[%c0, %c0_0, %c0_1, %c0_2] : memref<1x8x18x4xf32, #tpu.memory_space<vmem>>, vector<1x8x18x4xf32>
    %1 = vector.shape_cast %0 : vector<1x8x18x4xf32> to vector<8x18x4xf32>
    %c0_3 = arith.constant 0 : index
    %c0_4 = arith.constant 0 : index
    %c0_5 = arith.constant 0 : index
    %2 = vector.load %arg8[%c0_3, %c0_4, %c0_5] : memref<10x18x4xf32, #tpu.memory_space<vmem>>, vector<8x18x4xf32>
    tpu.vector_store %arg8[%c0_3, %c0_4, %c0_5], %1 {strides = array<i32>} : memref<10x18x4xf32, #tpu.memory_space<vmem>>, vector<8x18x4xf32>,
    %c0_6 = arith.constant 0 : index
    %c0_7 = arith.constant 0 : index
    %c0_8 = arith.constant 0 : index
    %c0_9 = arith.constant 0 : index
    %3 = vector.load %arg4[%c0_6, %c0_7, %c0_8, %c0_9] : memref<1x2x18x4xf32, #tpu.memory_space<vmem>>, vector<1x2x18x4xf32>
    %4 = vector.shape_cast %3 : vector<1x2x18x4xf32> to vector<2x18x4xf32>
    %c8 = arith.constant 8 : index
    %c0_10 = arith.constant 0 : index
    %c0_11 = arith.constant 0 : index
    %5 = vector.load %arg8[%c8, %c0_10, %c0_11] : memref<10x18x4xf32, #tpu.memory_space<vmem>>, vector<2x18x4xf32>
    tpu.vector_store %arg8[%c8, %c0_10, %c0_11], %4 {strides = array<i32>} : memref<10x18x4xf32, #tpu.memory_space<vmem>>, vector<2x18x4xf32>,
    %c0_12 = arith.constant 0 : index
    %c0_13 = arith.constant 0 : index
    %c0_14 = arith.constant 0 : index
    %6 = vector.load %arg8[%c0_12, %c0_13, %c0_14] : memref<10x18x4xf32, #tpu.memory_space<vmem>>, vector<10x16x4xf32>
    %c0_15 = arith.constant 0 : index
    %c1 = arith.constant 1 : index
    %c0_16 = arith.constant 0 : index
    %7 = vector.load %arg8[%c0_15, %c1, %c0_16] : memref<10x18x4xf32, #tpu.memory_space<vmem>>, vector<10x16x4xf32>
    %c0_17 = arith.constant 0 : index
    %c2 = arith.constant 2 : index
    %c0_18 = arith.constant 0 : index
    %8 = vector.load %arg8[%c0_17, %c2, %c0_18] : memref<10x18x4xf32, #tpu.memory_space<vmem>>, vector<10x16x4xf32>
    %c0_19 = arith.constant 0 : index
    %c0_20 = arith.constant 0 : index
    %9 = vector.load %arg6[%c0_19, %c0_20] : memref<1x4xf32, #tpu.memory_space<vmem>>, vector<1x4xf32>
    %cst = arith.constant 0.000000e+00 : f32
    %10 = vector.broadcast %cst : f32 to vector<128x4xf32>
    %cst_21 = arith.constant 0.000000e+00 : f32
    %11 = vector.broadcast %cst_21 : f32 to vector<128x4xf32>
    %cst_22 = arith.constant 0.000000e+00 : f32
    %12 = vector.broadcast %cst_22 : f32 to vector<128x4xf32>
    %cst_23 = arith.constant 0.000000e+00 : f32
    %13 = vector.broadcast %cst_23 : f32 to vector<128x4xf32>
    %14 = vector.extract_strided_slice %6 {offsets = [0, 0, 0], sizes = [8, 16, 4], strides = [1, 1, 1]} : vector<10x16x4xf32> to vector<8x16x4xf32>
    %15 = vector.shape_cast %14 : vector<8x16x4xf32> to vector<128x4xf32>
    %c0_24 = arith.constant 0 : index
    %c0_25 = arith.constant 0 : index
    %c0_26 = arith.constant 0 : index
    %16 = vector.load %arg5[%c0_24, %c0_25, %c0_26] : memref<16x4x4xf32, #tpu.memory_space<vmem>>, vector<1x4x4xf32>
    %17 = vector.shape_cast %16 : vector<1x4x4xf32> to vector<4x4xf32>
    %cst_27 = arith.constant dense<0.000000e+00> : vector<128x4xf32>
    %18 = tpu.matmul %15, %17, %cst_27 {dimension_numbers = #tpu.dot_dimension_numbers<[1], [0], [0], [1], [0, 0, 1, 1], [], []>} : vector<128x4xf32>, vector<4x4xf32>, vector<128x4xf32> -> vector<128x4xf32>
    %19 = arith.addf %10, %18 : vector<128x4xf32>
    %20 = vector.extract_strided_slice %7 {offsets = [0, 0, 0], sizes = [8, 16, 4], strides = [1, 1, 1]} : vector<10x16x4xf32> to vector<8x16x4xf32>
    %21 = vector.shape_cast %20 : vector<8x16x4xf32> to vector<128x4xf32>
    %c1_28 = arith.constant 1 : index
    %c0_29 = arith.constant 0 : index
    %c0_30 = arith.constant 0 : index
    %22 = vector.load %arg5[%c1_28, %c0_29, %c0_30] : memref<16x4x4xf32, #tpu.memory_space<vmem>>, vector<1x4x4xf32>
    %23 = vector.shape_cast %22 : vector<1x4x4xf32> to vector<4x4xf32>
    %cst_31 = arith.constant dense<0.000000e+00> : vector<128x4xf32>
    %24 = tpu.matmul %21, %23, %cst_31 {dimension_numbers = #tpu.dot_dimension_numbers<[1], [0], [0], [1], [0, 0, 1, 1], [], []>} : vector<128x4xf32>, vector<4x4xf32>, vector<128x4xf32> -> vector<128x4xf32>
    %25 = arith.addf %19, %24 : vector<128x4xf32>
    %c4 = arith.constant 4 : index
    %c0_32 = arith.constant 0 : index
    %c0_33 = arith.constant 0 : index
    %26 = vector.load %arg5[%c4, %c0_32, %c0_33] : memref<16x4x4xf32, #tpu.memory_space<vmem>>, vector<1x4x4xf32>
    %27 = vector.shape_cast %26 : vector<1x4x4xf32> to vector<4x4xf32>
    %cst_34 = arith.constant dense<0.000000e+00> : vector<128x4xf32>
    %28 = tpu.matmul %21, %27, %cst_34 {dimension_numbers = #tpu.dot_dimension_numbers<[1], [0], [0], [1], [0, 0, 1, 1], [], []>} : vector<128x4xf32>, vector<4x4xf32>, vector<128x4xf32> -> vector<128x4xf32>
    %29 = arith.addf %11, %28 : vector<128x4xf32>
    %30 = vector.extract_strided_slice %8 {offsets = [0, 0, 0], sizes = [8, 16, 4], strides = [1, 1, 1]} : vector<10x16x4xf32> to vector<8x16x4xf32>
    %31 = vector.shape_cast %30 : vector<8x16x4xf32> to vector<128x4xf32>
    %c5 = arith.constant 5 : index
    %c0_35 = arith.constant 0 : index
    %c0_36 = arith.constant 0 : index
    %32 = vector.load %arg5[%c5, %c0_35, %c0_36] : memref<16x4x4xf32, #tpu.memory_space<vmem>>, vector<1x4x4xf32>
    %33 = vector.shape_cast %32 : vector<1x4x4xf32> to vector<4x4xf32>
    %cst_37 = arith.constant dense<0.000000e+00> : vector<128x4xf32>
    %34 = tpu.matmul %31, %33, %cst_37 {dimension_numbers = #tpu.dot_dimension_numbers<[1], [0], [0], [1], [0, 0, 1, 1], [], []>} : vector<128x4xf32>, vector<4x4xf32>, vector<128x4xf32> -> vector<128x4xf32>
    %35 = arith.addf %29, %34 : vector<128x4xf32>
    %36 = vector.extract_strided_slice %6 {offsets = [1, 0, 0], sizes = [8, 16, 4], strides = [1, 1, 1]} : vector<10x16x4xf32> to vector<8x16x4xf32>
    %37 = vector.shape_cast %36 : vector<8x16x4xf32> to vector<128x4xf32>
    %c2_38 = arith.constant 2 : index
    %c0_39 = arith.constant 0 : index
    %c0_40 = arith.constant 0 : index
    %38 = vector.load %arg5[%c2_38, %c0_39, %c0_40] : memref<16x4x4xf32, #tpu.memory_space<vmem>>, vector<1x4x4xf32>
    %39 = vector.shape_cast %38 : vector<1x4x4xf32> to vector<4x4xf32>
    %cst_41 = arith.constant dense<0.000000e+00> : vector<128x4xf32>
    %40 = tpu.matmul %37, %39, %cst_41 {dimension_numbers = #tpu.dot_dimension_numbers<[1], [0], [0], [1], [0, 0, 1, 1], [], []>} : vector<128x4xf32>, vector<4x4xf32>, vector<128x4xf32> -> vector<128x4xf32>
    %41 = arith.addf %25, %40 : vector<128x4xf32>
    %c8_42 = arith.constant 8 : index
    %c0_43 = arith.constant 0 : index
    %c0_44 = arith.constant 0 : index
    %42 = vector.load %arg5[%c8_42, %c0_43, %c0_44] : memref<16x4x4xf32, #tpu.memory_space<vmem>>, vector<1x4x4xf32>
    %43 = vector.shape_cast %42 : vector<1x4x4xf32> to vector<4x4xf32>
    %cst_45 = arith.constant dense<0.000000e+00> : vector<128x4xf32>
    %44 = tpu.matmul %37, %43, %cst_45 {dimension_numbers = #tpu.dot_dimension_numbers<[1], [0], [0], [1], [0, 0, 1, 1], [], []>} : vector<128x4xf32>, vector<4x4xf32>, vector<128x4xf32> -> vector<128x4xf32>
    %45 = arith.addf %12, %44 : vector<128x4xf32>
    %46 = vector.extract_strided_slice %7 {offsets = [1, 0, 0], sizes = [8, 16, 4], strides = [1, 1, 1]} : vector<10x16x4xf32> to vector<8x16x4xf32>
    %47 = vector.shape_cast %46 : vector<8x16x4xf32> to vector<128x4xf32>
    %c3 = arith.constant 3 : index
    %c0_46 = arith.constant 0 : index
    %c0_47 = arith.constant 0 : index
    %48 = vector.load %arg5[%c3, %c0_46, %c0_47] : memref<16x4x4xf32, #tpu.memory_space<vmem>>, vector<1x4x4xf32>
    %49 = vector.shape_cast %48 : vector<1x4x4xf32> to vector<4x4xf32>
    %cst_48 = arith.constant dense<0.000000e+00> : vector<128x4xf32>
    %50 = tpu.matmul %47, %49, %cst_48 {dimension_numbers = #tpu.dot_dimension_numbers<[1], [0], [0], [1], [0, 0, 1, 1], [], []>} : vector<128x4xf32>, vector<4x4xf32>, vector<128x4xf32> -> vector<128x4xf32>
    %51 = arith.addf %41, %50 : vector<128x4xf32>
    %c6 = arith.constant 6 : index
    %c0_49 = arith.constant 0 : index
    %c0_50 = arith.constant 0 : index
    %52 = vector.load %arg5[%c6, %c0_49, %c0_50] : memref<16x4x4xf32, #tpu.memory_space<vmem>>, vector<1x4x4xf32>
    %53 = vector.shape_cast %52 : vector<1x4x4xf32> to vector<4x4xf32>
    %cst_51 = arith.constant dense<0.000000e+00> : vector<128x4xf32>
    %54 = tpu.matmul %47, %53, %cst_51 {dimension_numbers = #tpu.dot_dimension_numbers<[1], [0], [0], [1], [0, 0, 1, 1], [], []>} : vector<128x4xf32>, vector<4x4xf32>, vector<128x4xf32> -> vector<128x4xf32>
    %55 = arith.addf %35, %54 : vector<128x4xf32>
    %c9 = arith.constant 9 : index
    %c0_52 = arith.constant 0 : index
    %c0_53 = arith.constant 0 : index
    %56 = vector.load %arg5[%c9, %c0_52, %c0_53] : memref<16x4x4xf32, #tpu.memory_space<vmem>>, vector<1x4x4xf32>
    %57 = vector.shape_cast %56 : vector<1x4x4xf32> to vector<4x4xf32>
    %cst_54 = arith.constant dense<0.000000e+00> : vector<128x4xf32>
    %58 = tpu.matmul %47, %57, %cst_54 {dimension_numbers = #tpu.dot_dimension_numbers<[1], [0], [0], [1], [0, 0, 1, 1], [], []>} : vector<128x4xf32>, vector<4x4xf32>, vector<128x4xf32> -> vector<128x4xf32>
    %59 = arith.addf %45, %58 : vector<128x4xf32>
    %c12 = arith.constant 12 : index
    %c0_55 = arith.constant 0 : index
    %c0_56 = arith.constant 0 : index
    %60 = vector.load %arg5[%c12, %c0_55, %c0_56] : memref<16x4x4xf32, #tpu.memory_space<vmem>>, vector<1x4x4xf32>
    %61 = vector.shape_cast %60 : vector<1x4x4xf32> to vector<4x4xf32>
    %cst_57 = arith.constant dense<0.000000e+00> : vector<128x4xf32>
    %62 = tpu.matmul %47, %61, %cst_57 {dimension_numbers = #tpu.dot_dimension_numbers<[1], [0], [0], [1], [0, 0, 1, 1], [], []>} : vector<128x4xf32>, vector<4x4xf32>, vector<128x4xf32> -> vector<128x4xf32>
    %63 = arith.addf %13, %62 : vector<128x4xf32>
    %64 = vector.extract_strided_slice %8 {offsets = [1, 0, 0], sizes = [8, 16, 4], strides = [1, 1, 1]} : vector<10x16x4xf32> to vector<8x16x4xf32>
    %65 = vector.shape_cast %64 : vector<8x16x4xf32> to vector<128x4xf32>
    %c7 = arith.constant 7 : index
    %c0_58 = arith.constant 0 : index
    %c0_59 = arith.constant 0 : index
    %66 = vector.load %arg5[%c7, %c0_58, %c0_59] : memref<16x4x4xf32, #tpu.memory_space<vmem>>, vector<1x4x4xf32>
    %67 = vector.shape_cast %66 : vector<1x4x4xf32> to vector<4x4xf32>
    %cst_60 = arith.constant dense<0.000000e+00> : vector<128x4xf32>
    %68 = tpu.matmul %65, %67, %cst_60 {dimension_numbers = #tpu.dot_dimension_numbers<[1], [0], [0], [1], [0, 0, 1, 1], [], []>} : vector<128x4xf32>, vector<4x4xf32>, vector<128x4xf32> -> vector<128x4xf32>
    %69 = arith.addf %55, %68 : vector<128x4xf32>
    %c13 = arith.constant 13 : index
    %c0_61 = arith.constant 0 : index
    %c0_62 = arith.constant 0 : index
    %70 = vector.load %arg5[%c13, %c0_61, %c0_62] : memref<16x4x4xf32, #tpu.memory_space<vmem>>, vector<1x4x4xf32>
    %71 = vector.shape_cast %70 : vector<1x4x4xf32> to vector<4x4xf32>
    %cst_63 = arith.constant dense<0.000000e+00> : vector<128x4xf32>
    %72 = tpu.matmul %65, %71, %cst_63 {dimension_numbers = #tpu.dot_dimension_numbers<[1], [0], [0], [1], [0, 0, 1, 1], [], []>} : vector<128x4xf32>, vector<4x4xf32>, vector<128x4xf32> -> vector<128x4xf32>
    %73 = arith.addf %63, %72 : vector<128x4xf32>
    %74 = vector.extract_strided_slice %6 {offsets = [2, 0, 0], sizes = [8, 16, 4], strides = [1, 1, 1]} : vector<10x16x4xf32> to vector<8x16x4xf32>
    %75 = vector.shape_cast %74 : vector<8x16x4xf32> to vector<128x4xf32>
    %c10 = arith.constant 10 : index
    %c0_64 = arith.constant 0 : index
    %c0_65 = arith.constant 0 : index
    %76 = vector.load %arg5[%c10, %c0_64, %c0_65] : memref<16x4x4xf32, #tpu.memory_space<vmem>>, vector<1x4x4xf32>
    %77 = vector.shape_cast %76 : vector<1x4x4xf32> to vector<4x4xf32>
    %cst_66 = arith.constant dense<0.000000e+00> : vector<128x4xf32>
    %78 = tpu.matmul %75, %77, %cst_66 {dimension_numbers = #tpu.dot_dimension_numbers<[1], [0], [0], [1], [0, 0, 1, 1], [], []>} : vector<128x4xf32>, vector<4x4xf32>, vector<128x4xf32> -> vector<128x4xf32>
    %79 = arith.addf %59, %78 : vector<128x4xf32>
    %80 = vector.extract_strided_slice %7 {offsets = [2, 0, 0], sizes = [8, 16, 4], strides = [1, 1, 1]} : vector<10x16x4xf32> to vector<8x16x4xf32>
    %81 = vector.shape_cast %80 : vector<8x16x4xf32> to vector<128x4xf32>
    %c11 = arith.constant 11 : index
    %c0_67 = arith.constant 0 : index
    %c0_68 = arith.constant 0 : index
    %82 = vector.load %arg5[%c11, %c0_67, %c0_68] : memref<16x4x4xf32, #tpu.memory_space<vmem>>, vector<1x4x4xf32>
    %83 = vector.shape_cast %82 : vector<1x4x4xf32> to vector<4x4xf32>
    %cst_69 = arith.constant dense<0.000000e+00> : vector<128x4xf32>
    %84 = tpu.matmul %81, %83, %cst_69 {dimension_numbers = #tpu.dot_dimension_numbers<[1], [0], [0], [1], [0, 0, 1, 1], [], []>} : vector<128x4xf32>, vector<4x4xf32>, vector<128x4xf32> -> vector<128x4xf32>
    %85 = arith.addf %79, %84 : vector<128x4xf32>
    %c14 = arith.constant 14 : index
    %c0_70 = arith.constant 0 : index
    %c0_71 = arith.constant 0 : index
    %86 = vector.load %arg5[%c14, %c0_70, %c0_71] : memref<16x4x4xf32, #tpu.memory_space<vmem>>, vector<1x4x4xf32>
    %87 = vector.shape_cast %86 : vector<1x4x4xf32> to vector<4x4xf32>
    %cst_72 = arith.constant dense<0.000000e+00> : vector<128x4xf32>
    %88 = tpu.matmul %81, %87, %cst_72 {dimension_numbers = #tpu.dot_dimension_numbers<[1], [0], [0], [1], [0, 0, 1, 1], [], []>} : vector<128x4xf32>, vector<4x4xf32>, vector<128x4xf32> -> vector<128x4xf32>
    %89 = arith.addf %73, %88 : vector<128x4xf32>
    %90 = vector.extract_strided_slice %8 {offsets = [2, 0, 0], sizes = [8, 16, 4], strides = [1, 1, 1]} : vector<10x16x4xf32> to vector<8x16x4xf32>
    %91 = vector.shape_cast %90 : vector<8x16x4xf32> to vector<128x4xf32>
    %c15 = arith.constant 15 : index
    %c0_73 = arith.constant 0 : index
    %c0_74 = arith.constant 0 : index
    %92 = vector.load %arg5[%c15, %c0_73, %c0_74] : memref<16x4x4xf32, #tpu.memory_space<vmem>>, vector<1x4x4xf32>
    %93 = vector.shape_cast %92 : vector<1x4x4xf32> to vector<4x4xf32>
    %cst_75 = arith.constant dense<0.000000e+00> : vector<128x4xf32>
    %94 = tpu.matmul %91, %93, %cst_75 {dimension_numbers = #tpu.dot_dimension_numbers<[1], [0], [0], [1], [0, 0, 1, 1], [], []>} : vector<128x4xf32>, vector<4x4xf32>, vector<128x4xf32> -> vector<128x4xf32>
    %95 = arith.addf %89, %94 : vector<128x4xf32>
    %96 = vector.broadcast %9 : vector<1x4xf32> to vector<128x4xf32>
    %97 = arith.addf %51, %96 : vector<128x4xf32>
    %98 = vector.shape_cast %97 : vector<128x4xf32> to vector<8x16x4xf32>
    %c0_76 = arith.constant 0 : index
    %c0_77 = arith.constant 0 : index
    %c0_78 = arith.constant 0 : index
    %c0_79 = arith.constant 0 : index
    %c0_80 = arith.constant 0 : index
    %99 = vector.load %arg7[%c0_76, %c0_77, %c0_78, %c0_79, %c0_80] : memref<1x4x8x16x4xf32, #tpu.memory_space<vmem>>, vector<1x1x8x16x4xf32>
    %100 = vector.shape_cast %99 : vector<1x1x8x16x4xf32> to vector<8x16x4xf32>
    %101 = vector.shape_cast %98 : vector<8x16x4xf32> to vector<1x1x8x16x4xf32>
    tpu.vector_store %arg7[%c0_76, %c0_77, %c0_78, %c0_79, %c0_80], %101 {strides = array<i32>} : memref<1x4x8x16x4xf32, #tpu.memory_space<vmem>>, vector<1x1x8x16x4xf32>,
    %102 = vector.broadcast %9 : vector<1x4xf32> to vector<128x4xf32>
    %103 = arith.addf %69, %102 : vector<128x4xf32>
    %104 = vector.shape_cast %103 : vector<128x4xf32> to vector<8x16x4xf32>
    %c0_81 = arith.constant 0 : index
    %c1_82 = arith.constant 1 : index
    %c0_83 = arith.constant 0 : index
    %c0_84 = arith.constant 0 : index
    %c0_85 = arith.constant 0 : index
    %105 = vector.load %arg7[%c0_81, %c1_82, %c0_83, %c0_84, %c0_85] : memref<1x4x8x16x4xf32, #tpu.memory_space<vmem>>, vector<1x1x8x16x4xf32>
    %106 = vector.shape_cast %105 : vector<1x1x8x16x4xf32> to vector<8x16x4xf32>
    %107 = vector.shape_cast %104 : vector<8x16x4xf32> to vector<1x1x8x16x4xf32>
    tpu.vector_store %arg7[%c0_81, %c1_82, %c0_83, %c0_84, %c0_85], %107 {strides = array<i32>} : memref<1x4x8x16x4xf32, #tpu.memory_space<vmem>>, vector<1x1x8x16x4xf32>,
    %108 = vector.broadcast %9 : vector<1x4xf32> to vector<128x4xf32>
    %109 = arith.addf %85, %108 : vector<128x4xf32>
    %110 = vector.shape_cast %109 : vector<128x4xf32> to vector<8x16x4xf32>
    %c0_86 = arith.constant 0 : index
    %c2_87 = arith.constant 2 : index
    %c0_88 = arith.constant 0 : index
    %c0_89 = arith.constant 0 : index
    %c0_90 = arith.constant 0 : index
    %111 = vector.load %arg7[%c0_86, %c2_87, %c0_88, %c0_89, %c0_90] : memref<1x4x8x16x4xf32, #tpu.memory_space<vmem>>, vector<1x1x8x16x4xf32>
    %112 = vector.shape_cast %111 : vector<1x1x8x16x4xf32> to vector<8x16x4xf32>
    %113 = vector.shape_cast %110 : vector<8x16x4xf32> to vector<1x1x8x16x4xf32>
    tpu.vector_store %arg7[%c0_86, %c2_87, %c0_88, %c0_89, %c0_90], %113 {strides = array<i32>} : memref<1x4x8x16x4xf32, #tpu.memory_space<vmem>>, vector<1x1x8x16x4xf32>,
    %114 = vector.broadcast %9 : vector<1x4xf32> to vector<128x4xf32>
    %115 = arith.addf %95, %114 : vector<128x4xf32>
    %116 = vector.shape_cast %115 : vector<128x4xf32> to vector<8x16x4xf32>
    %c0_91 = arith.constant 0 : index
    %c3_92 = arith.constant 3 : index
    %c0_93 = arith.constant 0 : index
    %c0_94 = arith.constant 0 : index
    %c0_95 = arith.constant 0 : index
    %117 = vector.load %arg7[%c0_91, %c3_92, %c0_93, %c0_94, %c0_95] : memref<1x4x8x16x4xf32, #tpu.memory_space<vmem>>, vector<1x1x8x16x4xf32>
    %118 = vector.shape_cast %117 : vector<1x1x8x16x4xf32> to vector<8x16x4xf32>
    %119 = vector.shape_cast %116 : vector<8x16x4xf32> to vector<1x1x8x16x4xf32>
    tpu.vector_store %arg7[%c0_91, %c3_92, %c0_93, %c0_94, %c0_95], %119 {strides = array<i32>} : memref<1x4x8x16x4xf32, #tpu.memory_space<vmem>>, vector<1x1x8x16x4xf32>,
    return
  }
  func.func @transform_0(%arg0: i32, %arg1: i32, %arg2: i32) -> (i32, i32, i32, i32) {
    %c0_i32 = arith.constant 0 : i32
    %c0_i32_0 = arith.constant 0 : i32
    %c0_i32_1 = arith.constant 0 : i32
    return %arg0, %arg2, %c0_i32, %c0_i32_0 : i32, i32, i32, i32
  }
  func.func @transform_1(%arg0: i32, %arg1: i32, %arg2: i32) -> (i32, i32, i32, i32) {
    %c1_i32 = arith.constant 1 : i32
    %0 = arith.addi %arg2, %c1_i32 : i32
    %c4_i32 = arith.constant 4 : i32
    %1 = arith.muli %0, %c4_i32 : i32
    %c0_i32 = arith.constant 0 : i32
    %c0_i32_0 = arith.constant 0 : i32
    %c0_i32_1 = arith.constant 0 : i32
    return %arg0, %1, %c0_i32, %c0_i32_0 : i32, i32, i32, i32
  }
  func.func @transform_2(%arg0: i32, %arg1: i32, %arg2: i32) -> (i32, i32, i32) {
    %c0_i32 = arith.constant 0 : i32
    %c0_i32_0 = arith.constant 0 : i32
    %c0_i32_1 = arith.constant 0 : i32
    return %c0_i32, %c0_i32_0, %arg1 : i32, i32, i32
  }
  func.func @transform_3(%arg0: i32, %arg1: i32, %arg2: i32) -> (i32, i32) {
    %c0_i32 = arith.constant 0 : i32
    %c0_i32_0 = arith.constant 0 : i32
    return %c0_i32, %arg1 : i32, i32
  }
  func.func @transform_4(%arg0: i32, %arg1: i32, %arg2: i32) -> (i32, i32, i32, i32, i32) {
    %c0_i32 = arith.constant 0 : i32
    %c0_i32_0 = arith.constant 0 : i32
    %c0_i32_1 = arith.constant 0 : i32
    return %arg0, %c0_i32, %arg2, %c0_i32_0, %arg1 : i32, i32, i32, i32, i32
  }
}

</mosaic_0001>

<bundles_post_ra>
// kernel: upsample_forward.1
= control target key start
LH: loop header
LB: loop body
LE: loop exit
PB: predicated region body
PF: predicated region fallthrough
CT: control target
= control target key end

     0   :  { %s5125_s15 = smov 0   ;;  %s5127_s16 = smov 0   ;;  %s6336_s0 = inlined_call_operand.vmem [shape: f32[2,18,18,4], index: 0, kind: input, shape index: {}, may-alias: {0,1}]   ;;  %s6337_s1 = inlined_call_operand.vmem [shape: f32[2,18,18,4], index: 1, kind: input, shape index: {}, may-alias: {0,1}]   ;;  %s6338_s2 = inlined_call_operand.vmem [shape: f32[16,4,4], index: 2, kind: input, shape index: {}]   ;;  %s6339_s3 = inlined_call_operand.vmem [shape: f32[1,4], index: 3, kind: input, shape index: {}]   ;;  %s6340_s4 = inlined_call_operand.vmem [shape: f32[2,4,16,16,4], index: 4, kind: output, shape index: {}]  }
   0x1   :  { %s5129_s17 = smov 0   ;;  %s5131_s18 = smov 0  }
   0x2   :  { %s5133_s19 = smov 0   ;;  %s5135_s20 = smov 0  }
   0x3   :  { %s5137_s21 = smov 0  }
   0x4 LB: > { %s26_s22 = sadd.s32 1, %s5090_s19  ;;  %s33_s23 = sadd.s32 1, %s5094_s20  ;;  %s5098_s21 = sphi %s5137_s21, %s14_s21   ;;  %s5094_s20 = sphi %s5135_s20, %s6348_s20   ;;  %s5090_s19 = sphi %s5133_s19, %s6347_s19   ;;  %s5086_s18 = sphi %s5131_s18, %s6346_s18   ;;  %s5082_s17 = sphi %s5129_s17, %s6345_s17   ;;  %s5078_s16 = sphi %s5127_s16, %s6344_s16   ;;  %s5074_s15 = sphi %s5125_s15, %s6343_s15  }
   0x5   : > { %p27_p0 = scmp.ge.s32.totalorder %s26_s22, 2  ;;  %s3737_s24 = sadd.s32 4294967295, %s5098_s21  }
   0x6   : > { %p166_p1 = scmp.ne.s32.totalorder %s5078_s16, %s5074_s15  ;;  %p167_p2 = scmp.eq.s32.totalorder %s3737_s24, 3 }
   0x7   : > { %s6350_s22 = smov (%p27_p0, %s26_s22), 0  ;;  %s6352_s23 = smov (!%p27_p0, %s33_s23), %s5094_s20 }
   0x8   : > { %s150_s25 = ssub.s32 %s5090_s19, %s6350_s22  ;;  %p35_p3 = scmp.ge.s32.totalorder %s6352_s23, 2 }
   0x9   : > { %p3745_p4 = scmp.ge.s32.totalorder %s5098_s21, 1  ;;  %p5171_p5 = por %p167_p2, %p166_p1 }
   0xa   : > { %p246_p6 = scmp.lt.s32.totalorder %s5098_s21, 5  ;;  %s6354_s23 = smov (%p35_p3, %s6352_s23), 0 }
   0xb   : > { %s149_s27 = ssub.s32 %s5094_s20, %s6354_s23  ;;  %s156_s29 = sadd.s32 1, %s5078_s16 }
   0xc   : > { %p247_p7 = pnand %p3745_p4, %p246_p6  ;;  %s151_s28 = sor.u32 %s150_s25, %s149_s27 }
   0xd   : > { %p154_p8 = scmp.eq.s32.totalorder %s151_s28, 0  ;;  %v3752_v0 = vld [vmem:[%s6338_s2 + $0x4] sm:$0xf] (!%p247_p7)  ;;  %vm519_vm0 = vcmask (!%p247_p7), 1043456   ;;  %v3788_v1 = vld [vmem:[%s6338_s2 + $0x14] sm:$0xf] (!%p247_p7) }
   0xe   : > { %250 = sbr.rel (%p247_p7) target bundleno = 528 (0x210), region = 36  ;;  %s5191_s9 = sshll.u32 (!%p247_p7), %s5082_s17, 3  ;;  %4377 = vmatprep.subr.msk.mxu0 (!%p247_p7), %vm519_vm0, %v3752_v0  ;;  %4429 = vmatprep.subr.msk.mxu1 (!%p247_p7), %vm519_vm0, %v3788_v1  ;;  %v5200_v2 = vld [vmem:[%s6338_s2] sm:$0xf] (!%p247_p7)  ;;  %v5207_v3 = vld [vmem:[%s6338_s2 + $0x10] sm:$0xf] (!%p247_p7) }
   0xf   : > { %s5182_s30 = scalar_select %p154_p8, %s5078_s16, %s156_s29  }
  0x10   : > { %p306_p9 = scmp.lt.s32.totalorder (!%p247_p7), %s5086_s18, 1  ;;  %p308_p10 = scmp.lt.s32.totalorder (!%p247_p7), %s5191_s9, 17  ;;  %4378 = vmatpush3.msk.msra.mxu0 (!%p247_p7), %vm519_vm0, %v3752_v0  ;;  %4430 = vmatpush3.msk.msra.mxu1 (!%p247_p7), %vm519_vm0, %v3788_v1  ;;  %vm368_vm1 = vcmask (!%p247_p7), 31744   ;;  %vm371_vm2 = vcmask (!%p247_p7), 25600   ;;  %v5303_v34 = vld [vmem:[%s6338_s2 + $0x8] sm:$0xf] (!%p247_p7) }
  0x11   : > { %4403 = vmatprep.subr.msk.mxu0 (!%p247_p7), %vm519_vm0, %v5200_v2  ;;  %4455 = vmatprep.subr.msk.mxu1 (!%p247_p7), %vm519_vm0, %v5207_v3  ;;  %s4104_s8 = sadd.s32 (!%p247_p7), 8, %s5191_s9  ;;  %v5308_v35 = vld [vmem:[%s6338_s2 + $0x18] sm:$0xf] (!%p247_p7) }
  0x12   : > { %p5249_p11 = scmp.lt.s32.totalorder (!%p247_p7), %s4104_s8, 17 }
  0x15   : > { %s5210_s14 = scalar_select %p306_p9, %s5086_s18, 1 }
  0x16   : > { %s309_s24 = scalar_select %p308_p10, %s5191_s9, 17 }
  0x17   : > { %s4986_s25 = smul.u32 54, %s5210_s14  ;;  %s6356_s8 = smov (!%p5249_p11, %s4104_s8), 17 }
  0x18   : > { %s4985_s27 = smul.u32 3, %s309_s24  ;;  %s297_s9 = sand.u32 1, %s5074_s15  }
  0x19   : > { %s4987_s24 = smul.u32 3, %s6356_s8  ;;  %s3746_s11 = sshll.u32 %s297_s9, 9 }
  0x1a   : > { %s312_s28 = sadd.s32 %s4986_s25, %s4985_s27  ;;  %s4102_s15 = sshll.u32 (%p5171_p5), %s5082_s17, 4 }
  0x1b   : > { %s3748_s29 = sshll.u32 %s312_s28, 3  ;;  %s330_s27 = sadd.s32 %s4987_s24, %s4986_s25 }
  0x1c   : > { %s5223_s7 = scalar_lea.vmem %s6336_s0, %s3748_s29  ;;  %s3751_s28 = sshll.u32 %s330_s27, 3 }
  0x1d   : > { %v344_v4 = vld [vmem:[%s5223_s7] sm:$0xff]  ;;  %v345_v5 = vld [vmem:[%s5223_s7 + $0x8] sm:$0xff]  ;;  %v346_v6 = vld [vmem:[%s5223_s7 + $0x10] sm:$0x3]  ;;  %s5368_s29 = scalar_lea.vmem %s6337_s1, %s3751_s28  ;;  %s5986_s24 = scalar_lea.vmem [#allocation3], %s3746_s11 }
  0x1e   : > { %369 = vst.msk [vmem:[#allocation2] sm:$0xff] %vm368_vm1, %v344_v4  ;;  %370 = vst.msk [vmem:[#allocation2 + $0x8] sm:$0xff] %vm368_vm1, %v345_v5  ;;  %v347_v7 = vld [vmem:[%s5223_s7 + $0x18] sm:$0xff]  ;;  %v348_v8 = vld [vmem:[%s5223_s7 + $0x20] sm:$0xff]  ;;  %s4091_s27 = sshll.u32 (%p5171_p5), %s5086_s18, 7 }
  0x1f   : > { %372 = vst.msk [vmem:[#allocation2 + $0x10] sm:$0x3] %vm371_vm2, %v346_v6  ;;  %v349_v9 = vld [vmem:[%s5223_s7 + $0x28] sm:$0x3]  ;;  %v350_v10 = vld [vmem:[%s5223_s7 + $0x30] sm:$0xff]  ;;  %v351_v11 = vld [vmem:[%s5223_s7 + $0x38] sm:$0xff]  ;;  %s3324_s26 = sadd.s32 (%p5171_p5), %s4102_s15, %s4091_s27 }
  0x20   : > { %373 = vst.msk [vmem:[#allocation2 + $0x18] sm:$0xff] %vm368_vm1, %v347_v7  ;;  %374 = vst.msk [vmem:[#allocation2 + $0x20] sm:$0xff] %vm368_vm1, %v348_v8  ;;  %v352_v12 = vld [vmem:[%s5223_s7 + $0x40] sm:$0x3]  ;;  %v353_v13 = vld [vmem:[%s5223_s7 + $0x48] sm:$0xff]  ;;  %s4092_s28 = sshll.u32 (%p5171_p5), %s3324_s26, 3 }
  0x21   : > { %375 = vst.msk [vmem:[#allocation2 + $0x28] sm:$0x3] %vm371_vm2, %v349_v9  ;;  %378 = vst.msk [vmem:[#allocation2 + $0x40] sm:$0x3] %vm371_vm2, %v352_v12  ;;  %v354_v14 = vld [vmem:[%s5223_s7 + $0x50] sm:$0xff]  ;;  %v356_v16 = vld [vmem:[%s5223_s7 + $0x60] sm:$0xff] }
  0x22   : > { %376 = vst.msk [vmem:[#allocation2 + $0x30] sm:$0xff] %vm368_vm1, %v350_v10  ;;  %377 = vst.msk [vmem:[#allocation2 + $0x38] sm:$0xff] %vm368_vm1, %v351_v11  ;;  %v355_v15 = vld [vmem:[%s5223_s7 + $0x58] sm:$0x3]  ;;  %v357_v17 = vld [vmem:[%s5223_s7 + $0x68] sm:$0xff] }
  0x23   : > { %379 = vst.msk [vmem:[#allocation2 + $0x48] sm:$0xff] %vm368_vm1, %v353_v13  ;;  %380 = vst.msk [vmem:[#allocation2 + $0x50] sm:$0xff] %vm368_vm1, %v354_v14  ;;  %v358_v18 = vld [vmem:[%s5223_s7 + $0x70] sm:$0x3]  ;;  %v359_v19 = vld [vmem:[%s5223_s7 + $0x78] sm:$0xff] }
  0x24   : > { %381 = vst.msk [vmem:[#allocation2 + $0x58] sm:$0x3] %vm371_vm2, %v355_v15  ;;  %384 = vst.msk [vmem:[#allocation2 + $0x70] sm:$0x3] %vm371_vm2, %v358_v18  ;;  %v360_v20 = vld [vmem:[%s5223_s7 + $0x80] sm:$0xff]  ;;  %v362_v22 = vld [vmem:[%s5223_s7 + $0x90] sm:$0xff] }
  0x25   : > { %382 = vst.msk [vmem:[#allocation2 + $0x60] sm:$0xff] %vm368_vm1, %v356_v16  ;;  %383 = vst.msk [vmem:[#allocation2 + $0x68] sm:$0xff] %vm368_vm1, %v357_v17  ;;  %v361_v21 = vld [vmem:[%s5223_s7 + $0x88] sm:$0x3]  ;;  %v363_v23 = vld [vmem:[%s5223_s7 + $0x98] sm:$0xff] }
  0x26   : > { %385 = vst.msk [vmem:[#allocation2 + $0x78] sm:$0xff] %vm368_vm1, %v359_v19  ;;  %386 = vst.msk [vmem:[#allocation2 + $0x80] sm:$0xff] %vm368_vm1, %v360_v20  ;;  %v364_v24 = vld [vmem:[%s5223_s7 + $0xa0] sm:$0x3]  ;;  %v365_v25 = vld [vmem:[%s5223_s7 + $0xa8] sm:$0xff] }
  0x27   : > { %387 = vst.msk [vmem:[#allocation2 + $0x88] sm:$0x3] %vm371_vm2, %v361_v21  ;;  %390 = vst.msk [vmem:[#allocation2 + $0xa0] sm:$0x3] %vm371_vm2, %v364_v24  ;;  %v366_v26 = vld [vmem:[%s5223_s7 + $0xb0] sm:$0xff]  ;;  %v5283_v28 = vld [vmem:[#allocation2 + $0x1] sm:$0xff] }
  0x28   : > { %388 = vst.msk [vmem:[#allocation2 + $0x90] sm:$0xff] %vm368_vm1, %v362_v22  ;;  %389 = vst.msk [vmem:[#allocation2 + $0x98] sm:$0xff] %vm368_vm1, %v363_v23  ;;  %v367_v27 = vld [vmem:[%s5223_s7 + $0xb8] sm:$0x3]  ;;  %v447_v29 = vld [vmem:[#allocation2 + $0x2] sm:$0xff]  ;;  %4379 = vmatprep.mubr.msk.f32.mxu0 %vm368_vm1, %v5283_v28 }
  0x29   : > { %v5285_v30 = vld [vmem:[#allocation2 + $0x9] sm:$0xff]  ;;  %391 = vst.msk [vmem:[#allocation2 + $0xa8] sm:$0xff] %vm368_vm1, %v365_v25  ;;  %392 = vst.msk [vmem:[#allocation2 + $0xb0] sm:$0xff] %vm368_vm1, %v366_v26  ;;  %4431 = vmatprep.mubr.msk.f32.mxu1 %vm368_vm1, %v447_v29  ;;  %v5293_v32 = vld [vmem:[#allocation2 + $0x19] sm:$0xff] }
  0x2a   : > { %393 = vst.msk [vmem:[#allocation2 + $0xb8] sm:$0x3] %vm371_vm2, %v367_v27  ;;  %v448_v31 = vld [vmem:[#allocation2 + $0xa] sm:$0xff]  ;;  %v5295_v33 = vld [vmem:[#allocation2 + $0x1a] sm:$0xff]  ;;  %4380 = vmatmul.mubr.msk.f32.vlgmr.msra.gmra.mrb[0].mxu0 %vm368_vm1, %v5285_v30  ;;  %v5316_v37 = vld [vmem:[#allocation2 + $0x22] sm:$0xff] }
  0x2b   : > { %4432 = vmatmul.mubr.msk.f32.vlgmr.msra.gmra.mrb[0].mxu1 %vm368_vm1, %v448_v31  ;;  %4404 = vmatpush3.msk.msra.mxu0 %vm519_vm0, %v5200_v2  ;;  %v5314_v36 = vld [vmem:[#allocation2 + $0x21] sm:$0xff]  ;;  %v5323_v38 = vld [vmem:[#allocation2 + $0x31] sm:$0xff]  ;;  %v5339_v40 = vld [vmem:[#allocation2 + $0x39] sm:$0xff] }
  0x2c   : > { %4456 = vmatpush3.msk.msra.mxu1 %vm519_vm0, %v5207_v3  ;;  %4382 = vmatprep.mubr.msk.f32.mxu0 %vm368_vm1, %v5293_v32  ;;  %v5325_v39 = vld [vmem:[#allocation2 + $0x32] sm:$0xff]  ;;  %v5341_v41 = vld [vmem:[#allocation2 + $0x3a] sm:$0xff]  ;;  %v5345_v42 = vld [vmem:[#allocation2 + $0x49] sm:$0xff] }
  0x2d   : > { %4434 = vmatprep.mubr.msk.f32.mxu1 %vm368_vm1, %v5295_v33  ;;  %4481 = vmatprep.subr.msk.mxu0 %vm519_vm0, %v5303_v34  ;;  %v5347_v43 = vld [vmem:[#allocation2 + $0x4a] sm:$0xff]  ;;  %v5359_v45 = vld [vmem:[#allocation2 + $0x52] sm:$0xff]  ;;  %v5361_v46 = vld [vmem:[#allocation2 + $0x61] sm:$0xff] }
  0x2e   : > { %4533 = vmatprep.subr.msk.mxu1 %vm519_vm0, %v5308_v35  ;;  %4383 = vmatmul.mubr.msk.f32.gmra.mrb[2].mxu0 %vm368_vm1, %v5314_v36  ;;  %v5357_v44 = vld [vmem:[#allocation2 + $0x51] sm:$0xff]  ;;  %v5363_v47 = vld [vmem:[#allocation2 + $0x62] sm:$0xff]  ;;  %v5382_v50 = vld [vmem:[#allocation2 + $0x79] sm:$0xff] }
  0x2f   : > { %4435 = vmatmul.mubr.msk.f32.gmra.mrb[2].mxu1 %vm368_vm1, %v5316_v37  ;;  %4385 = vmatprep.mubr.msk.f32.mxu0 %vm368_vm1, %v5323_v38  ;;  %v5374_v48 = vld [vmem:[#allocation2 + $0x69] sm:$0xff]  ;;  %v5384_v51 = vld [vmem:[#allocation2 + $0x7a] sm:$0xff]  ;;  %v5404_v57 = vld [vmem:[#allocation2 + $0x91] sm:$0xff] }
  0x30   : > { %4437 = vmatprep.mubr.msk.f32.mxu1 %vm368_vm1, %v5325_v39  ;;  %v5380_v49 = vld [vmem:[#allocation2 + $0x6a] sm:$0xff]  ;;  %v394_v52 = vld [vmem:[%s5368_s29] sm:$0xff]  ;;  %v5406_v58 = vld [vmem:[#allocation2 + $0x92] sm:$0xff] }
  0x31   : > { %v395_v53 = vld [vmem:[%s5368_s29 + $0x8] sm:$0xff]  ;;  %v396_v54 = vld [vmem:[%s5368_s29 + $0x10] sm:$0x3]  ;;  %401 = vst.msk [vmem:[#allocation2 + $0xc0] sm:$0xff] %vm368_vm1, %v394_v52  ;;  %v5416_v59 = vld [vmem:[#allocation2 + $0x99] sm:$0xff] }
  0x32   : > { %4386 = vmatmul.mubr.msk.f32.gmra.mrb[4].mxu0 %vm368_vm1, %v5339_v40  ;;  %402 = vst.msk [vmem:[#allocation2 + $0xc8] sm:$0xff] %vm368_vm1, %v395_v53  ;;  %v5400_v55 = vld [vmem:[#allocation2 + $0x81] sm:$0xff]  ;;  %v5420_v61 = vld [vmem:[#allocation2 + $0xa9] sm:$0xff]  ;;  %v5432_v63 = vld [vmem:[#allocation2 + $0xb1] sm:$0xff] }
  0x33   : > { %4438 = vmatmul.mubr.msk.f32.gmra.mrb[4].mxu1 %vm368_vm1, %v5341_v41  ;;  %4388 = vmatprep.mubr.msk.f32.mxu0 %vm368_vm1, %v5345_v42  ;;  %403 = vst.msk [vmem:[#allocation2 + $0xd0] sm:$0x3] %vm371_vm2, %v396_v54  ;;  %v5402_v56 = vld [vmem:[#allocation2 + $0x82] sm:$0xff]  ;;  %v5418_v60 = vld [vmem:[#allocation2 + $0x9a] sm:$0xff]  ;;  %v5422_v62 = vld [vmem:[#allocation2 + $0xaa] sm:$0xff] }
  0x34   : > { %4440 = vmatprep.mubr.msk.f32.mxu1 %vm368_vm1, %v5347_v43  ;;  %v5434_v0 = vld [vmem:[#allocation2 + $0xb2] sm:$0xff]  ;;  %v407_v1 = vld [vmem:[#allocation2] sm:$0xff]  ;;  %v408_v2 = vld [vmem:[#allocation2 + $0x8] sm:$0xff] }
  0x35   : > { %v5443_v3 = vld [vmem:[#allocation2 + $0x18] sm:$0xff]  ;;  %v3842_v4 = vld [vmem:[%s6338_s2 + $0xc] sm:$0xf]  ;;  %v3878_v5 = vld [vmem:[%s6338_s2 + $0x24] sm:$0xf] }
  0x36   : > { %4389 = vmatmul.mubr.msk.f32.gmra.mrb[6].mxu0 %vm368_vm1, %v5357_v44  ;;  %v5458_v6 = vld [vmem:[#allocation2 + $0x20] sm:$0xff]  ;;  %v5464_v7 = vld [vmem:[#allocation2 + $0x30] sm:$0xff]  ;;  %v5476_v8 = vld [vmem:[#allocation2 + $0x38] sm:$0xff] }
  0x37   : > { %4441 = vmatmul.mubr.msk.f32.gmra.mrb[6].mxu1 %vm368_vm1, %v5359_v45  ;;  %4391 = vmatprep.mubr.msk.f32.mxu0 %vm368_vm1, %v5361_v46  ;;  %v5478_v9 = vld [vmem:[#allocation2 + $0x48] sm:$0xff]  ;;  %v5488_v10 = vld [vmem:[#allocation2 + $0x50] sm:$0xff]  ;;  %v5490_v11 = vld [vmem:[#allocation2 + $0x60] sm:$0xff] }
  0x38   : > { %4443 = vmatprep.mubr.msk.f32.mxu1 %vm368_vm1, %v5363_v47  ;;  %v5500_v12 = vld [vmem:[#allocation2 + $0x68] sm:$0xff]  ;;  %v5502_v13 = vld [vmem:[#allocation2 + $0x78] sm:$0xff]  ;;  %v5512_v14 = vld [vmem:[#allocation2 + $0x80] sm:$0xff] }
  0x39   : > { %v5514_v15 = vld [vmem:[#allocation2 + $0x90] sm:$0xff]  ;;  %v5524_v16 = vld [vmem:[#allocation2 + $0x98] sm:$0xff]  ;;  %v5526_v17 = vld [vmem:[#allocation2 + $0xa8] sm:$0xff] }
  0x3a   : > { %4392 = vmatmul.mubr.msk.f32.gmra.mrb[8].mxu0 %vm368_vm1, %v5374_v48  ;;  %v5536_v18 = vld [vmem:[#allocation2 + $0xb0] sm:$0xff]  ;;  %v3841_v19 = vld [vmem:[%s6338_s2 + $0x20] sm:$0xf]  ;;  %v397_v21 = vld [vmem:[%s5368_s29 + $0x18] sm:$0xff] }
  0x3b   : > { %4444 = vmatmul.mubr.msk.f32.gmra.mrb[8].mxu1 %vm368_vm1, %v5380_v49  ;;  %4394 = vmatprep.mubr.msk.f32.mxu0 %vm368_vm1, %v5382_v50  ;;  %v3932_v20 = vld [vmem:[%s6338_s2 + $0x34] sm:$0xf]  ;;  %v398_v22 = vld [vmem:[%s5368_s29 + $0x20] sm:$0xff]  ;;  %404 = vst.msk [vmem:[#allocation2 + $0xd8] sm:$0xff] %vm368_vm1, %v397_v21  ;;  %v399_v23 = vld [vmem:[%s5368_s29 + $0x28] sm:$0x3]  ;;  %s6194_s29 = scalar_lea.vmem (%p5171_p5), %s6340_s4, %s4092_s28 }
  0x3c   : > { %4446 = vmatprep.mubr.msk.f32.mxu1 %vm368_vm1, %v5384_v51  ;;  %405 = vst.msk [vmem:[#allocation2 + $0xe0] sm:$0xff] %vm368_vm1, %v398_v22  ;;  %v5610_v24 = vld [vmem:[#allocation2 + $0xc0] sm:$0xff]  ;;  %v5622_v26 = vld [vmem:[#allocation2 + $0xc8] sm:$0xff]  ;;  %v3913_v29 = vld [vmem:[%s6338_s2 + $0x30] sm:$0xf] }
  0x3d   : > { %406 = vst.msk [vmem:[#allocation2 + $0xe8] sm:$0x3] %vm371_vm2, %v399_v23  ;;  %v5612_v25 = vld [vmem:[#allocation2 + $0xc1] sm:$0xff]  ;;  %v5624_v27 = vld [vmem:[#allocation2 + $0xc9] sm:$0xff]  ;;  %v4003_v31 = vld [vmem:[%s6338_s2 + $0x38] sm:$0xf] }
  0x3e   : > { %4395 = vmatmul.mubr.msk.f32.gmra.mrb[10].mxu0 %vm368_vm1, %v5400_v55  ;;  %v3985_v52 = vld [vmem:[%s6338_s2 + $0x2c] sm:$0xf]  ;;  %v4021_v53 = vld [vmem:[%s6338_s2 + $0x3c] sm:$0xf] }
  0x3f   : > { %4447 = vmatmul.mubr.msk.f32.gmra.mrb[10].mxu1 %vm368_vm1, %v5402_v56  ;;  %4397 = vmatprep.mubr.msk.f32.mxu0 %vm368_vm1, %v5404_v57 }
  0x40   : > { %4449 = vmatprep.mubr.msk.f32.mxu1 %vm368_vm1, %v5406_v58 }
  0x42   : > { %4398 = vmatmul.mubr.msk.f32.gmra.mrb[12].mxu0 %vm368_vm1, %v5416_v59 }
  0x43   : > { %4450 = vmatmul.mubr.msk.f32.gmra.mrb[12].mxu1 %vm368_vm1, %v5418_v60  ;;  %4400 = vmatprep.mubr.msk.f32.mxu0 %vm368_vm1, %v5420_v61 }
  0x44   : > { %4452 = vmatprep.mubr.msk.f32.mxu1 %vm368_vm1, %v5422_v62 }
  0x46   : > { %4401 = vmatmul.mubr.msk.f32.gmra.mrb[14].mxu0 %vm368_vm1, %v5432_v63 }
  0x47   : > { %4453 = vmatmul.mubr.msk.f32.gmra.mrb[14].mxu1 %vm368_vm1, %v5434_v0  ;;  %4405 = vmatprep.mubr.msk.f32.mxu0 %vm368_vm1, %v407_v1 }
  0x48   : > { %4457 = vmatprep.mubr.msk.f32.mxu1 %vm368_vm1, %v5283_v28  ;;  %v3914_v28 = vld [vmem:[%s6338_s2 + $0x1c] sm:$0xf] }
  0x4a   : > { %4406 = vmatmul.mubr.msk.f32.vlgmr.msra.gmra.mrb[0].mxu0 %vm368_vm1, %v408_v2 }
  0x4b   : > { %4458 = vmatmul.mubr.msk.f32.vlgmr.msra.gmra.mrb[0].mxu1 %vm368_vm1, %v5285_v30  ;;  %4482 = vmatpush3.msk.msra.mxu0 %vm519_vm0, %v5303_v34  ;;  %v3967_v30 = vld [vmem:[%s6338_s2 + $0x28] sm:$0xf] }
  0x4c   : > { %4534 = vmatpush3.msk.msra.mxu1 %vm519_vm0, %v5308_v35  ;;  %4408 = vmatprep.mubr.msk.f32.mxu0 %vm368_vm1, %v5443_v3  ;;  %v5766_v34 = vld [vmem:[#allocation2 + $0xc2] sm:$0xff]  ;;  %v5776_v35 = vld [vmem:[#allocation2 + $0xca] sm:$0xff] }
  0x4d   : > { %4460 = vmatprep.mubr.msk.f32.mxu1 %vm368_vm1, %v5293_v32  ;;  %4507 = vmatprep.subr.msk.mxu0 %vm519_vm0, %v3842_v4 }
  0x4e   : > { %4559 = vmatprep.subr.msk.mxu1 %vm519_vm0, %v3878_v5  ;;  %4409 = vmatmul.mubr.msk.f32.gmra.mrb[2].mxu0 %vm368_vm1, %v5458_v6 }
  0x4f   : > { %4461 = vmatmul.mubr.msk.f32.gmra.mrb[2].mxu1 %vm368_vm1, %v5314_v36  ;;  %4411 = vmatprep.mubr.msk.f32.mxu0 %vm368_vm1, %v5464_v7 }
  0x50   : > { %4463 = vmatprep.mubr.msk.f32.mxu1 %vm368_vm1, %v5323_v38 }
  0x52   : > { %4412 = vmatmul.mubr.msk.f32.gmra.mrb[4].mxu0 %vm368_vm1, %v5476_v8 }
  0x53   : > { %4464 = vmatmul.mubr.msk.f32.gmra.mrb[4].mxu1 %vm368_vm1, %v5339_v40  ;;  %4414 = vmatprep.mubr.msk.f32.mxu0 %vm368_vm1, %v5478_v9 }
  0x54   : > { %4466 = vmatprep.mubr.msk.f32.mxu1 %vm368_vm1, %v5345_v42 }
  0x56   : > { %4415 = vmatmul.mubr.msk.f32.gmra.mrb[6].mxu0 %vm368_vm1, %v5488_v10 }
  0x57   : > { %4467 = vmatmul.mubr.msk.f32.gmra.mrb[6].mxu1 %vm368_vm1, %v5357_v44  ;;  %4417 = vmatprep.mubr.msk.f32.mxu0 %vm368_vm1, %v5490_v11 }
  0x58   : > { %4469 = vmatprep.mubr.msk.f32.mxu1 %vm368_vm1, %v5361_v46 }
  0x5a   : > { %4418 = vmatmul.mubr.msk.f32.gmra.mrb[8].mxu0 %vm368_vm1, %v5500_v12 }
  0x5b   : > { %4470 = vmatmul.mubr.msk.f32.gmra.mrb[8].mxu1 %vm368_vm1, %v5374_v48  ;;  %4420 = vmatprep.mubr.msk.f32.mxu0 %vm368_vm1, %v5502_v13 }
  0x5c   : > { %4472 = vmatprep.mubr.msk.f32.mxu1 %vm368_vm1, %v5382_v50 }
  0x5e   : > { %4421 = vmatmul.mubr.msk.f32.gmra.mrb[10].mxu0 %vm368_vm1, %v5512_v14 }
  0x5f   : > { %4473 = vmatmul.mubr.msk.f32.gmra.mrb[10].mxu1 %vm368_vm1, %v5400_v55  ;;  %4423 = vmatprep.mubr.msk.f32.mxu0 %vm368_vm1, %v5514_v15 }
  0x60   : > { %4475 = vmatprep.mubr.msk.f32.mxu1 %vm368_vm1, %v5404_v57 }
  0x62   : > { %4424 = vmatmul.mubr.msk.f32.gmra.mrb[12].mxu0 %vm368_vm1, %v5524_v16 }
  0x63   : > { %4476 = vmatmul.mubr.msk.f32.gmra.mrb[12].mxu1 %vm368_vm1, %v5416_v59  ;;  %4426 = vmatprep.mubr.msk.f32.mxu0 %vm368_vm1, %v5526_v17 }
  0x64   : > { %4478 = vmatprep.mubr.msk.f32.mxu1 %vm368_vm1, %v5420_v61 }
  0x66   : > { %4427 = vmatmul.mubr.msk.f32.gmra.mrb[14].mxu0 %vm368_vm1, %v5536_v18 }
  0x67   : > { %4479 = vmatmul.mubr.msk.f32.gmra.mrb[14].mxu1 %vm368_vm1, %v5432_v63  ;;  %4483 = vmatprep.mubr.msk.f32.mxu0 %vm368_vm1, %v5443_v3 }
  0x68   : > { %4535 = vmatprep.mubr.msk.f32.mxu1 %vm368_vm1, %v5293_v32 }
  0x6a   : > { %4484 = vmatmul.mubr.msk.f32.vlgmr.msra.gmra.mrb[0].mxu0 %vm368_vm1, %v5458_v6 }
  0x6b   : > { %4536 = vmatmul.mubr.msk.f32.vlgmr.msra.gmra.mrb[0].mxu1 %vm368_vm1, %v5314_v36  ;;  %4508 = vmatpush3.msk.msra.mxu0 %vm519_vm0, %v3842_v4 }
  0x6c   : > { %4560 = vmatpush3.msk.msra.mxu1 %vm519_vm0, %v3878_v5  ;;  %4486 = vmatprep.mubr.msk.f32.mxu0 %vm368_vm1, %v5464_v7 }
  0x6d   : > { %4538 = vmatprep.mubr.msk.f32.mxu1 %vm368_vm1, %v5323_v38  ;;  %4585 = vmatprep.subr.msk.mxu1 %vm519_vm0, %v3841_v19 }
  0x6e   : > { %4637 = vmatprep.subr.msk.mxu0 %vm519_vm0, %v3932_v20  ;;  %4487 = vmatmul.mubr.msk.f32.gmra.mrb[2].mxu0 %vm368_vm1, %v5476_v8 }
  0x6f   : > { %4539 = vmatmul.mubr.msk.f32.gmra.mrb[2].mxu1 %vm368_vm1, %v5339_v40  ;;  %4489 = vmatprep.mubr.msk.f32.mxu0 %vm368_vm1, %v5478_v9 }
  0x70   : > { %4541 = vmatprep.mubr.msk.f32.mxu1 %vm368_vm1, %v5345_v42 }
  0x72   : > { %4490 = vmatmul.mubr.msk.f32.gmra.mrb[4].mxu0 %vm368_vm1, %v5488_v10 }
  0x73   : > { %4542 = vmatmul.mubr.msk.f32.gmra.mrb[4].mxu1 %vm368_vm1, %v5357_v44  ;;  %4492 = vmatprep.mubr.msk.f32.mxu0 %vm368_vm1, %v5490_v11 }
  0x74   : > { %4544 = vmatprep.mubr.msk.f32.mxu1 %vm368_vm1, %v5361_v46 }
  0x76   : > { %4493 = vmatmul.mubr.msk.f32.gmra.mrb[6].mxu0 %vm368_vm1, %v5500_v12 }
  0x77   : > { %4545 = vmatmul.mubr.msk.f32.gmra.mrb[6].mxu1 %vm368_vm1, %v5374_v48  ;;  %4495 = vmatprep.mubr.msk.f32.mxu0 %vm368_vm1, %v5502_v13 }
  0x78   : > { %4547 = vmatprep.mubr.msk.f32.mxu1 %vm368_vm1, %v5382_v50 }
  0x7a   : > { %4496 = vmatmul.mubr.msk.f32.gmra.mrb[8].mxu0 %vm368_vm1, %v5512_v14 }
  0x7b   : > { %4548 = vmatmul.mubr.msk.f32.gmra.mrb[8].mxu1 %vm368_vm1, %v5400_v55  ;;  %4498 = vmatprep.mubr.msk.f32.mxu0 %vm368_vm1, %v5514_v15 }
  0x7c   : > { %4550 = vmatprep.mubr.msk.f32.mxu1 %vm368_vm1, %v5404_v57 }
  0x7e   : > { %4499 = vmatmul.mubr.msk.f32.gmra.mrb[10].mxu0 %vm368_vm1, %v5524_v16 }
  0x7f   : > { %4551 = vmatmul.mubr.msk.f32.gmra.mrb[10].mxu1 %vm368_vm1, %v5416_v59  ;;  %4501 = vmatprep.mubr.msk.f32.mxu0 %vm368_vm1, %v5526_v17 }
  0x80   : > { %4553 = vmatprep.mubr.msk.f32.mxu1 %vm368_vm1, %v5420_v61 }
  0x82   : > { %4502 = vmatmul.mubr.msk.f32.gmra.mrb[12].mxu0 %vm368_vm1, %v5536_v18 }
  0x83   : > { %4554 = vmatmul.mubr.msk.f32.gmra.mrb[12].mxu1 %vm368_vm1, %v5432_v63  ;;  %4504 = vmatprep.mubr.msk.f32.mxu0 %vm368_vm1, %v5610_v24 }
  0x84   : > { %4556 = vmatprep.mubr.msk.f32.mxu1 %vm368_vm1, %v5612_v25 }
  0x86   : > { %4505 = vmatmul.mubr.msk.f32.gmra.mrb[14].mxu0 %vm368_vm1, %v5622_v26 }
  0x87   : > { %4557 = vmatmul.mubr.msk.f32.gmra.mrb[14].mxu1 %vm368_vm1, %v5624_v27  ;;  %4509 = vmatprep.mubr.msk.f32.mxu0 %vm368_vm1, %v5293_v32 }
  0x88   : > { %4561 = vmatprep.mubr.msk.f32.mxu1 %vm368_vm1, %v5293_v32 }
  0x8a   : > { %4510 = vmatmul.mubr.msk.f32.vlgmr.msra.gmra.mrb[0].mxu0 %vm368_vm1, %v5314_v36 }
  0x8b   : > { %4562 = vmatmul.mubr.msk.f32.vlgmr.msra.gmra.mrb[16].mxu1 %vm368_vm1, %v5314_v36  ;;  %4638 = vmatpush3.msk.msra.mxu0 %vm519_vm0, %v3932_v20 }
  0x8c   : > { %4586 = vmatpush3.msk.msra.mxu1 %vm519_vm0, %v3841_v19  ;;  %4512 = vmatprep.mubr.msk.f32.mxu0 %vm368_vm1, %v5323_v38 }
  0x8d   : > { %4564 = vmatprep.mubr.msk.f32.mxu1 %vm368_vm1, %v5323_v38  ;;  %4611 = vmatprep.subr.msk.mxu1 %vm519_vm0, %v3914_v28 }
  0x8e   : > { %4663 = vmatprep.subr.msk.mxu0 %vm519_vm0, %v3913_v29  ;;  %4513 = vmatmul.mubr.msk.f32.gmra.mrb[2].mxu0 %vm368_vm1, %v5339_v40 }
  0x8f   : > { %4565 = vmatmul.mubr.msk.f32.gmra.mrb[18].mxu1 %vm368_vm1, %v5339_v40  ;;  %4515 = vmatprep.mubr.msk.f32.mxu0 %vm368_vm1, %v5345_v42 }
  0x90   : > { %4567 = vmatprep.mubr.msk.f32.mxu1 %vm368_vm1, %v5345_v42 }
  0x92   : > { %4516 = vmatmul.mubr.msk.f32.gmra.mrb[4].mxu0 %vm368_vm1, %v5357_v44 }
  0x93   : > { %4568 = vmatmul.mubr.msk.f32.gmra.mrb[20].mxu1 %vm368_vm1, %v5357_v44  ;;  %4518 = vmatprep.mubr.msk.f32.mxu0 %vm368_vm1, %v5361_v46 }
  0x94   : > { %4570 = vmatprep.mubr.msk.f32.mxu1 %vm368_vm1, %v5361_v46 }
  0x96   : > { %4519 = vmatmul.mubr.msk.f32.gmra.mrb[6].mxu0 %vm368_vm1, %v5374_v48 }
  0x97   : > { %4571 = vmatmul.mubr.msk.f32.gmra.mrb[22].mxu1 %vm368_vm1, %v5374_v48  ;;  %4521 = vmatprep.mubr.msk.f32.mxu0 %vm368_vm1, %v5382_v50 }
  0x98   : > { %4573 = vmatprep.mubr.msk.f32.mxu1 %vm368_vm1, %v5382_v50 }
  0x9a   : > { %4522 = vmatmul.mubr.msk.f32.gmra.mrb[8].mxu0 %vm368_vm1, %v5400_v55 }
  0x9b   : > { %4574 = vmatmul.mubr.msk.f32.gmra.mrb[24].mxu1 %vm368_vm1, %v5400_v55  ;;  %4524 = vmatprep.mubr.msk.f32.mxu0 %vm368_vm1, %v5404_v57 }
  0x9c   : > { %4576 = vmatprep.mubr.msk.f32.mxu1 %vm368_vm1, %v5404_v57 }
  0x9e   : > { %4525 = vmatmul.mubr.msk.f32.gmra.mrb[10].mxu0 %vm368_vm1, %v5416_v59 }
  0x9f   : > { %4577 = vmatmul.mubr.msk.f32.gmra.mrb[26].mxu1 %vm368_vm1, %v5416_v59  ;;  %4527 = vmatprep.mubr.msk.f32.mxu0 %vm368_vm1, %v5420_v61 }
  0xa0   : > { %4579 = vmatprep.mubr.msk.f32.mxu1 %vm368_vm1, %v5420_v61 }
  0xa2   : > { %4528 = vmatmul.mubr.msk.f32.gmra.mrb[12].mxu0 %vm368_vm1, %v5432_v63 }
  0xa3   : > { %4580 = vmatmul.mubr.msk.f32.gmra.mrb[28].mxu1 %vm368_vm1, %v5432_v63  ;;  %4530 = vmatprep.mubr.msk.f32.mxu0 %vm368_vm1, %v5612_v25 }
  0xa4   : > { %4582 = vmatprep.mubr.msk.f32.mxu1 %vm368_vm1, %v5612_v25 }
  0xa6   : > { %4531 = vmatmul.mubr.msk.f32.gmra.mrb[14].mxu0 %vm368_vm1, %v5624_v27 }
  0xa7   : > { %4583 = vmatmul.mubr.msk.f32.gmra.mrb[30].mxu1 %vm368_vm1, %v5624_v27  ;;  %4639 = vmatprep.mubr.msk.f32.mxu0 %vm368_vm1, %v5295_v33 }
  0xa8   : > { %4587 = vmatprep.mubr.msk.f32.mxu1 %vm368_vm1, %v5443_v3 }
  0xaa   : > { %4640 = vmatmul.mubr.msk.f32.vlgmr.msra.gmra.mrb[16].mxu0 %vm368_vm1, %v5316_v37 }
  0xab   : > { %4588 = vmatmul.mubr.msk.f32.vlgmr.msra.gmra.mrb[16].mxu1 %vm368_vm1, %v5458_v6  ;;  %4664 = vmatpush3.msk.msra.mxu0 %vm519_vm0, %v3913_v29 }
  0xac   : > { %4612 = vmatpush3.msk.msra.mxu1 %vm519_vm0, %v3914_v28  ;;  %4590 = vmatprep.mubr.msk.f32.mxu1 %vm368_vm1, %v5464_v7 }
  0xad   : > { %4642 = vmatprep.mubr.msk.f32.mxu0 %vm368_vm1, %v5325_v39  ;;  %4689 = vmatprep.subr.msk.mxu1 %vm519_vm0, %v3967_v30 }
  0xae   : > { %4741 = vmatprep.subr.msk.mxu0 %vm519_vm0, %v4003_v31  ;;  %4643 = vmatmul.mubr.msk.f32.gmra.mrb[18].mxu0 %vm368_vm1, %v5341_v41 }
  0xaf   : > { %4591 = vmatmul.mubr.msk.f32.gmra.mrb[18].mxu1 %vm368_vm1, %v5476_v8  ;;  %4645 = vmatprep.mubr.msk.f32.mxu0 %vm368_vm1, %v5347_v43 }
  0xb0   : > { %4593 = vmatprep.mubr.msk.f32.mxu1 %vm368_vm1, %v5478_v9 }
  0xb2   : > { %4646 = vmatmul.mubr.msk.f32.gmra.mrb[20].mxu0 %vm368_vm1, %v5359_v45 }
  0xb3   : > { %4594 = vmatmul.mubr.msk.f32.gmra.mrb[20].mxu1 %vm368_vm1, %v5488_v10  ;;  %4648 = vmatprep.mubr.msk.f32.mxu0 %vm368_vm1, %v5363_v47 }
  0xb4   : > { %4596 = vmatprep.mubr.msk.f32.mxu1 %vm368_vm1, %v5490_v11 }
  0xb6   : > { %4649 = vmatmul.mubr.msk.f32.gmra.mrb[22].mxu0 %vm368_vm1, %v5380_v49 }
  0xb7   : > { %4597 = vmatmul.mubr.msk.f32.gmra.mrb[22].mxu1 %vm368_vm1, %v5500_v12  ;;  %4651 = vmatprep.mubr.msk.f32.mxu0 %vm368_vm1, %v5384_v51 }
  0xb8   : > { %4599 = vmatprep.mubr.msk.f32.mxu1 %vm368_vm1, %v5502_v13 }
  0xba   : > { %4652 = vmatmul.mubr.msk.f32.gmra.mrb[24].mxu0 %vm368_vm1, %v5402_v56 }
  0xbb   : > { %4600 = vmatmul.mubr.msk.f32.gmra.mrb[24].mxu1 %vm368_vm1, %v5512_v14  ;;  %4654 = vmatprep.mubr.msk.f32.mxu0 %vm368_vm1, %v5406_v58 }
  0xbc   : > { %4602 = vmatprep.mubr.msk.f32.mxu1 %vm368_vm1, %v5514_v15 }
  0xbe   : > { %4655 = vmatmul.mubr.msk.f32.gmra.mrb[26].mxu0 %vm368_vm1, %v5418_v60 }
  0xbf   : > { %4603 = vmatmul.mubr.msk.f32.gmra.mrb[26].mxu1 %vm368_vm1, %v5524_v16  ;;  %4657 = vmatprep.mubr.msk.f32.mxu0 %vm368_vm1, %v5422_v62 }
  0xc0   : > { %4605 = vmatprep.mubr.msk.f32.mxu1 %vm368_vm1, %v5526_v17 }
  0xc2   : > { %4658 = vmatmul.mubr.msk.f32.gmra.mrb[28].mxu0 %vm368_vm1, %v5434_v0 }
  0xc3   : > { %4606 = vmatmul.mubr.msk.f32.gmra.mrb[28].mxu1 %vm368_vm1, %v5536_v18  ;;  %4660 = vmatprep.mubr.msk.f32.mxu0 %vm368_vm1, %v5766_v34 }
  0xc4   : > { %4608 = vmatprep.mubr.msk.f32.mxu1 %vm368_vm1, %v5610_v24 }
  0xc6   : > { %4661 = vmatmul.mubr.msk.f32.gmra.mrb[30].mxu0 %vm368_vm1, %v5776_v35 }
  0xc7   : > { %4609 = vmatmul.mubr.msk.f32.gmra.mrb[30].mxu1 %vm368_vm1, %v5622_v26  ;;  %4665 = vmatprep.mubr.msk.f32.mxu0 %vm368_vm1, %v5293_v32  ;;  %v425_v32 = vld [vmem:[#allocation2 + $0xd8] sm:$0xff] }
  0xc8   : > { %4613 = vmatprep.mubr.msk.f32.mxu1 %vm368_vm1, %v5295_v33  ;;  %v445_v33 = vld [vmem:[#allocation2 + $0xd9] sm:$0xff] }
  0xca   : > { %4666 = vmatmul.mubr.msk.f32.vlgmr.msra.gmra.mrb[16].mxu0 %vm368_vm1, %v5314_v36  ;;  %v426_v36 = vld [vmem:[#allocation2 + $0xe0] sm:$0xff] }
  0xcb   : > { %4614 = vmatmul.mubr.msk.f32.vlgmr.msra.gmra.mrb[0].mxu1 %vm368_vm1, %v5316_v37  ;;  %4742 = vmatpush3.msk.msra.mxu0 %vm519_vm0, %v4003_v31  ;;  %v446_v37 = vld [vmem:[#allocation2 + $0xe1] sm:$0xff] }
  0xcc   : > { %4690 = vmatpush3.msk.msra.mxu1 %vm519_vm0, %v3967_v30  ;;  %4616 = vmatprep.mubr.msk.f32.mxu1 %vm368_vm1, %v5325_v39 }
  0xcd   : > { %4668 = vmatprep.mubr.msk.f32.mxu0 %vm368_vm1, %v5323_v38  ;;  %4715 = vmatprep.subr.msk.mxu1 %vm519_vm0, %v3985_v52 }
  0xce   : > { %4767 = vmatprep.subr.msk.mxu0 %vm519_vm0, %v4021_v53  ;;  %4669 = vmatmul.mubr.msk.f32.gmra.mrb[18].mxu0 %vm368_vm1, %v5339_v40 }
  0xcf   : > { %4617 = vmatmul.mubr.msk.f32.gmra.mrb[2].mxu1 %vm368_vm1, %v5341_v41  ;;  %4671 = vmatprep.mubr.msk.f32.mxu0 %vm368_vm1, %v5345_v42 }
  0xd0   : > { %4619 = vmatprep.mubr.msk.f32.mxu1 %vm368_vm1, %v5347_v43 }
  0xd2   : > { %4672 = vmatmul.mubr.msk.f32.gmra.mrb[20].mxu0 %vm368_vm1, %v5357_v44 }
  0xd3   : > { %4620 = vmatmul.mubr.msk.f32.gmra.mrb[4].mxu1 %vm368_vm1, %v5359_v45  ;;  %4674 = vmatprep.mubr.msk.f32.mxu0 %vm368_vm1, %v5361_v46 }
  0xd4   : > { %4622 = vmatprep.mubr.msk.f32.mxu1 %vm368_vm1, %v5363_v47 }
  0xd6   : > { %4675 = vmatmul.mubr.msk.f32.gmra.mrb[22].mxu0 %vm368_vm1, %v5374_v48 }
  0xd7   : > { %4623 = vmatmul.mubr.msk.f32.gmra.mrb[6].mxu1 %vm368_vm1, %v5380_v49  ;;  %4677 = vmatprep.mubr.msk.f32.mxu0 %vm368_vm1, %v5382_v50 }
  0xd8   : > { %4625 = vmatprep.mubr.msk.f32.mxu1 %vm368_vm1, %v5384_v51 }
  0xda   : > { %4678 = vmatmul.mubr.msk.f32.gmra.mrb[24].mxu0 %vm368_vm1, %v5400_v55 }
  0xdb   : > { %4626 = vmatmul.mubr.msk.f32.gmra.mrb[8].mxu1 %vm368_vm1, %v5402_v56  ;;  %4680 = vmatprep.mubr.msk.f32.mxu0 %vm368_vm1, %v5404_v57 }
  0xdc   : > { %4628 = vmatprep.mubr.msk.f32.mxu1 %vm368_vm1, %v5406_v58 }
  0xde   : > { %4681 = vmatmul.mubr.msk.f32.gmra.mrb[26].mxu0 %vm368_vm1, %v5416_v59 }
  0xdf   : > { %4629 = vmatmul.mubr.msk.f32.gmra.mrb[10].mxu1 %vm368_vm1, %v5418_v60  ;;  %4683 = vmatprep.mubr.msk.f32.mxu0 %vm368_vm1, %v5420_v61 }
  0xe0   : > { %4631 = vmatprep.mubr.msk.f32.mxu1 %vm368_vm1, %v5422_v62 }
  0xe2   : > { %4684 = vmatmul.mubr.msk.f32.gmra.mrb[28].mxu0 %vm368_vm1, %v5432_v63 }
  0xe3   : > { %4632 = vmatmul.mubr.msk.f32.gmra.mrb[12].mxu1 %vm368_vm1, %v5434_v0  ;;  %4686 = vmatprep.mubr.msk.f32.mxu0 %vm368_vm1, %v5612_v25 }
  0xe4   : > { %4634 = vmatprep.mubr.msk.f32.mxu1 %vm368_vm1, %v5766_v34 }
  0xe6   : > { %4687 = vmatmul.mubr.msk.f32.gmra.mrb[30].mxu0 %vm368_vm1, %v5624_v27 }
  0xe7   : > { %4635 = vmatmul.mubr.msk.f32.gmra.mrb[14].mxu1 %vm368_vm1, %v5776_v35  ;;  %4743 = vmatprep.mubr.msk.f32.mxu0 %vm368_vm1, %v5323_v38 }
  0xe8   : > { %4691 = vmatprep.mubr.msk.f32.mxu1 %vm368_vm1, %v5464_v7 }
  0xea   : > { %4744 = vmatmul.mubr.msk.f32.vlgmr.msra.gmra.mrb[16].mxu0 %vm368_vm1, %v5339_v40 }
  0xeb   : > { %4692 = vmatmul.mubr.msk.f32.vlgmr.msra.gmra.mrb[16].mxu1 %vm368_vm1, %v5476_v8  ;;  %4768 = vmatpush3.msk.msra.mxu0 %vm519_vm0, %v4021_v53 }
  0xec   : > { %4716 = vmatpush3.msk.msra.mxu1 %vm519_vm0, %v3985_v52  ;;  %4694 = vmatprep.mubr.msk.f32.mxu1 %vm368_vm1, %v5478_v9 }
  0xed   : > { %4746 = vmatprep.mubr.msk.f32.mxu0 %vm368_vm1, %v5345_v42 }
  0xee   : > { %4747 = vmatmul.mubr.msk.f32.gmra.mrb[18].mxu0 %vm368_vm1, %v5357_v44 }
  0xef   : > { %4695 = vmatmul.mubr.msk.f32.gmra.mrb[18].mxu1 %vm368_vm1, %v5488_v10  ;;  %4749 = vmatprep.mubr.msk.f32.mxu0 %vm368_vm1, %v5361_v46 }
  0xf0   : > { %4697 = vmatprep.mubr.msk.f32.mxu1 %vm368_vm1, %v5490_v11 }
  0xf2   : > { %4750 = vmatmul.mubr.msk.f32.gmra.mrb[20].mxu0 %vm368_vm1, %v5374_v48 }
  0xf3   : > { %4698 = vmatmul.mubr.msk.f32.gmra.mrb[20].mxu1 %vm368_vm1, %v5500_v12  ;;  %4752 = vmatprep.mubr.msk.f32.mxu0 %vm368_vm1, %v5382_v50 }
  0xf4   : > { %4700 = vmatprep.mubr.msk.f32.mxu1 %vm368_vm1, %v5502_v13 }
  0xf6   : > { %4753 = vmatmul.mubr.msk.f32.gmra.mrb[22].mxu0 %vm368_vm1, %v5400_v55 }
  0xf7   : > { %4701 = vmatmul.mubr.msk.f32.gmra.mrb[22].mxu1 %vm368_vm1, %v5512_v14  ;;  %4755 = vmatprep.mubr.msk.f32.mxu0 %vm368_vm1, %v5404_v57 }
  0xf8   : > { %4703 = vmatprep.mubr.msk.f32.mxu1 %vm368_vm1, %v5514_v15 }
  0xfa   : > { %4756 = vmatmul.mubr.msk.f32.gmra.mrb[24].mxu0 %vm368_vm1, %v5416_v59 }
  0xfb   : > { %4704 = vmatmul.mubr.msk.f32.gmra.mrb[24].mxu1 %vm368_vm1, %v5524_v16  ;;  %4758 = vmatprep.mubr.msk.f32.mxu0 %vm368_vm1, %v5420_v61 }
  0xfc   : > { %4706 = vmatprep.mubr.msk.f32.mxu1 %vm368_vm1, %v5526_v17 }
  0xfe   : > { %4759 = vmatmul.mubr.msk.f32.gmra.mrb[26].mxu0 %vm368_vm1, %v5432_v63 }
  0xff   : > { %4707 = vmatmul.mubr.msk.f32.gmra.mrb[26].mxu1 %vm368_vm1, %v5536_v18  ;;  %4761 = vmatprep.mubr.msk.f32.mxu0 %vm368_vm1, %v5612_v25 }
 0x100   : > { %4709 = vmatprep.mubr.msk.f32.mxu1 %vm368_vm1, %v5610_v24 }
 0x102   : > { %4762 = vmatmul.mubr.msk.f32.gmra.mrb[28].mxu0 %vm368_vm1, %v5624_v27 }
 0x103   : > { %4710 = vmatmul.mubr.msk.f32.gmra.mrb[28].mxu1 %vm368_vm1, %v5622_v26  ;;  %4764 = vmatprep.mubr.msk.f32.mxu0 %vm368_vm1, %v445_v33 }
 0x104   : > { %4712 = vmatprep.mubr.msk.f32.mxu1 %vm368_vm1, %v425_v32 }
 0x106   : > { %4765 = vmatmul.mubr.msk.f32.gmra.mrb[30].mxu0 %vm368_vm1, %v446_v37 }
 0x107   : > { %4713 = vmatmul.mubr.msk.f32.gmra.mrb[30].mxu1 %vm368_vm1, %v426_v36  ;;  %4769 = vmatprep.mubr.msk.f32.mxu0 %vm368_vm1, %v5325_v39  ;;  %v466_v39 = vld [vmem:[#allocation2 + $0xe2] sm:$0xff] }
 0x108   : > { %4717 = vmatprep.mubr.msk.f32.mxu1 %vm368_vm1, %v5323_v38  ;;  %v465_v38 = vld [vmem:[#allocation2 + $0xda] sm:$0xff] }
 0x10a   : > { %4770 = vmatmul.mubr.msk.f32.vlgmr.msra.gmra.mrb[16].mxu0 %vm368_vm1, %v5341_v41 }
 0x10b   : > { %4718 = vmatmul.mubr.msk.f32.vlgmr.msra.gmra.mrb[16].mxu1 %vm368_vm1, %v5339_v40  ;;  %4772 = vmatprep.mubr.msk.f32.mxu0 %vm368_vm1, %v5347_v43  ;;  %v5982_v40 = vld [vmem:[%s6339_s3] ss:$0 sm:$0xff] }
 0x10c   : > { %4720 = vmatprep.mubr.msk.f32.mxu1 %vm368_vm1, %v5345_v42 }
 0x10e   : > { %4773 = vmatmul.mubr.msk.f32.gmra.mrb[18].mxu0 %vm368_vm1, %v5359_v45 }
 0x10f   : > { %4721 = vmatmul.mubr.msk.f32.gmra.mrb[18].mxu1 %vm368_vm1, %v5357_v44  ;;  %4775 = vmatprep.mubr.msk.f32.mxu0 %vm368_vm1, %v5363_v47 }
 0x110   : > { %4723 = vmatprep.mubr.msk.f32.mxu1 %vm368_vm1, %v5361_v46 }
 0x112   : > { %4776 = vmatmul.mubr.msk.f32.gmra.mrb[20].mxu0 %vm368_vm1, %v5380_v49 }
 0x113   : > { %4724 = vmatmul.mubr.msk.f32.gmra.mrb[20].mxu1 %vm368_vm1, %v5374_v48  ;;  %4778 = vmatprep.mubr.msk.f32.mxu0 %vm368_vm1, %v5384_v51 }
 0x114   : > { %4726 = vmatprep.mubr.msk.f32.mxu1 %vm368_vm1, %v5382_v50 }
 0x116   : > { %4779 = vmatmul.mubr.msk.f32.gmra.mrb[22].mxu0 %vm368_vm1, %v5402_v56 }
 0x117   : > { %4727 = vmatmul.mubr.msk.f32.gmra.mrb[22].mxu1 %vm368_vm1, %v5400_v55  ;;  %4781 = vmatprep.mubr.msk.f32.mxu0 %vm368_vm1, %v5406_v58 }
 0x118   : > { %4729 = vmatprep.mubr.msk.f32.mxu1 %vm368_vm1, %v5404_v57 }
 0x11a   : > { %4782 = vmatmul.mubr.msk.f32.gmra.mrb[24].mxu0 %vm368_vm1, %v5418_v60 }
 0x11b   : > { %4730 = vmatmul.mubr.msk.f32.gmra.mrb[24].mxu1 %vm368_vm1, %v5416_v59  ;;  %4784 = vmatprep.mubr.msk.f32.mxu0 %vm368_vm1, %v5422_v62 }
 0x11c   : > { %4732 = vmatprep.mubr.msk.f32.mxu1 %vm368_vm1, %v5420_v61 }
 0x11e   : > { %4785 = vmatmul.mubr.msk.f32.gmra.mrb[26].mxu0 %vm368_vm1, %v5434_v0 }
 0x11f   : > { %4733 = vmatmul.mubr.msk.f32.gmra.mrb[26].mxu1 %vm368_vm1, %v5432_v63  ;;  %4787 = vmatprep.mubr.msk.f32.mxu0 %vm368_vm1, %v5766_v34 }
 0x120   : > { %4735 = vmatprep.mubr.msk.f32.mxu1 %vm368_vm1, %v5612_v25 }
 0x122   : > { %4788 = vmatmul.mubr.msk.f32.gmra.mrb[28].mxu0 %vm368_vm1, %v5776_v35 }
 0x123   : > { %4736 = vmatmul.mubr.msk.f32.gmra.mrb[28].mxu1 %vm368_vm1, %v5624_v27  ;;  %4790 = vmatprep.mubr.msk.f32.mxu0 %vm368_vm1, %v465_v38 }
 0x124   : > { %4738 = vmatprep.mubr.msk.f32.mxu1 %vm368_vm1, %v445_v33 }
 0x126   : > { %4791 = vmatmul.mubr.msk.f32.gmra.mrb[30].mxu0 %vm368_vm1, %v466_v39 }
 0x127   : > { %4739 = vmatmul.mubr.msk.f32.gmra.mrb[30].mxu1 %vm368_vm1, %v446_v37 }
 0x15d   : > { %v4511_v41 = vpop.f32.mrb[0].mxu0 }
 0x15e   : > { %v3183_v42 = vadd.f32 %v4511_v41, %v5982_v40  ;;  %v1463_v43 = vpop.f32.mrb[1].mxu0 }
 0x15f   : > { %v3182_v44 = vadd.f32 %v5982_v40, %v1463_v43 }
 0x160   : > { %3199 = vst.msk [vmem:[%s5986_s24 + $0x8] sm:$0xff] %vm368_vm1, %v3183_v42 }
 0x161   : > { %3198 = vst.msk [vmem:[%s5986_s24] sm:$0xff] %vm368_vm1, %v3182_v44  ;;  %v4514_v45 = vpop.f32.mrb[2].mxu0 }
 0x162   : > { %v3185_v46 = vadd.f32 %v4514_v45, %v5982_v40  ;;  %v1473_v47 = vpop.f32.mrb[3].mxu0 }
 0x163   : > { %v3184_v48 = vadd.f32 %v5982_v40, %v1473_v47 }
 0x164   : > { %3201 = vst.msk [vmem:[%s5986_s24 + $0x18] sm:$0xff] %vm368_vm1, %v3185_v46 }
 0x165   : > { %3200 = vst.msk [vmem:[%s5986_s24 + $0x10] sm:$0xff] %vm368_vm1, %v3184_v48  ;;  %v4517_v49 = vpop.f32.mrb[4].mxu0 }
 0x166   : > { %v3187_v50 = vadd.f32 %v4517_v49, %v5982_v40  ;;  %v1483_v51 = vpop.f32.mrb[5].mxu0 }
 0x167   : > { %v3186_v54 = vadd.f32 %v5982_v40, %v1483_v51 }
 0x168   : > { %3203 = vst.msk [vmem:[%s5986_s24 + $0x28] sm:$0xff] %vm368_vm1, %v3187_v50 }
 0x169   : > { %3202 = vst.msk [vmem:[%s5986_s24 + $0x20] sm:$0xff] %vm368_vm1, %v3186_v54  ;;  %v4520_v55 = vpop.f32.mrb[6].mxu0 }
 0x16a   : > { %v3189_v56 = vadd.f32 %v4520_v55, %v5982_v40  ;;  %v1493_v57 = vpop.f32.mrb[7].mxu0 }
 0x16b   : > { %v3188_v58 = vadd.f32 %v5982_v40, %v1493_v57 }
 0x16c   : > { %3205 = vst.msk [vmem:[%s5986_s24 + $0x38] sm:$0xff] %vm368_vm1, %v3189_v56 }
 0x16d   : > { %3204 = vst.msk [vmem:[%s5986_s24 + $0x30] sm:$0xff] %vm368_vm1, %v3188_v58  ;;  %v4523_v59 = vpop.f32.mrb[8].mxu0 }
 0x16e   : > { %v3191_v60 = vadd.f32 %v4523_v59, %v5982_v40  ;;  %v1503_v61 = vpop.f32.mrb[9].mxu0 }
 0x16f   : > { %v3190_v62 = vadd.f32 %v5982_v40, %v1503_v61 }
 0x170   : > { %3207 = vst.msk [vmem:[%s5986_s24 + $0x48] sm:$0xff] %vm368_vm1, %v3191_v60 }
 0x171   : > { %3206 = vst.msk [vmem:[%s5986_s24 + $0x40] sm:$0xff] %vm368_vm1, %v3190_v62  ;;  %v4526_v63 = vpop.f32.mrb[10].mxu0 }
 0x172   : > { %v3193_v0 = vadd.f32 %v4526_v63, %v5982_v40  ;;  %v1513_v1 = vpop.f32.mrb[11].mxu0 }
 0x173   : > { %v3192_v2 = vadd.f32 %v5982_v40, %v1513_v1 }
 0x174   : > { %3209 = vst.msk [vmem:[%s5986_s24 + $0x58] sm:$0xff] %vm368_vm1, %v3193_v0 }
 0x175   : > { %3208 = vst.msk [vmem:[%s5986_s24 + $0x50] sm:$0xff] %vm368_vm1, %v3192_v2  ;;  %v4529_v3 = vpop.f32.mrb[12].mxu0 }
 0x176   : > { %v3195_v4 = vadd.f32 %v4529_v3, %v5982_v40  ;;  %v1523_v5 = vpop.f32.mrb[13].mxu0 }
 0x177   : > { %v3194_v6 = vadd.f32 %v5982_v40, %v1523_v5 }
 0x178   : > { %3211 = vst.msk [vmem:[%s5986_s24 + $0x68] sm:$0xff] %vm368_vm1, %v3195_v4 }
 0x179   : > { %3210 = vst.msk [vmem:[%s5986_s24 + $0x60] sm:$0xff] %vm368_vm1, %v3194_v6  ;;  %v4532_v7 = vpop.f32.mrb[14].mxu0 }
 0x17a   : > { %v3197_v8 = vadd.f32 %v4532_v7, %v5982_v40  ;;  %v1533_v9 = vpop.f32.mrb[15].mxu0 }
 0x17b   : > { %v3196_v10 = vadd.f32 %v5982_v40, %v1533_v9 }
 0x17c   : > { %3213 = vst.msk [vmem:[%s5986_s24 + $0x78] sm:$0xff] %vm368_vm1, %v3197_v8 }
 0x17d   : > { %3212 = vst.msk [vmem:[%s5986_s24 + $0x70] sm:$0xff] %vm368_vm1, %v3196_v10 }
 0x19e   : > { %v4615_v11 = vpop.f32.mrb[0].mxu1 }
 0x19f   : > { %v3215_v12 = vadd.f32 %v4615_v11, %v5982_v40  ;;  %v2101_v13 = vpop.f32.mrb[1].mxu1 }
 0x1a0   : > { %v3214_v14 = vadd.f32 %v5982_v40, %v2101_v13 }
 0x1a1   : > { %4041 = vst.msk [vmem:[%s5986_s24 + $0x88] sm:$0xff] %vm368_vm1, %v3215_v12 }
 0x1a2   : > { %4040 = vst.msk [vmem:[%s5986_s24 + $0x80] sm:$0xff] %vm368_vm1, %v3214_v14  ;;  %v4618_v15 = vpop.f32.mrb[2].mxu1 }
 0x1a3   : > { %v3217_v16 = vadd.f32 %v4618_v15, %v5982_v40  ;;  %v2111_v17 = vpop.f32.mrb[3].mxu1 }
 0x1a4   : > { %v3216_v18 = vadd.f32 %v5982_v40, %v2111_v17 }
 0x1a5   : > { %4043 = vst.msk [vmem:[%s5986_s24 + $0x98] sm:$0xff] %vm368_vm1, %v3217_v16 }
 0x1a6   : > { %4042 = vst.msk [vmem:[%s5986_s24 + $0x90] sm:$0xff] %vm368_vm1, %v3216_v18  ;;  %v4621_v19 = vpop.f32.mrb[4].mxu1 }
 0x1a7   : > { %v3219_v20 = vadd.f32 %v4621_v19, %v5982_v40  ;;  %v2121_v21 = vpop.f32.mrb[5].mxu1 }
 0x1a8   : > { %v3218_v22 = vadd.f32 %v5982_v40, %v2121_v21 }
 0x1a9   : > { %4045 = vst.msk [vmem:[%s5986_s24 + $0xa8] sm:$0xff] %vm368_vm1, %v3219_v20 }
 0x1aa   : > { %4044 = vst.msk [vmem:[%s5986_s24 + $0xa0] sm:$0xff] %vm368_vm1, %v3218_v22  ;;  %v4624_v23 = vpop.f32.mrb[6].mxu1 }
 0x1ab   : > { %v3221_v24 = vadd.f32 %v4624_v23, %v5982_v40  ;;  %v2131_v25 = vpop.f32.mrb[7].mxu1 }
 0x1ac   : > { %v3220_v26 = vadd.f32 %v5982_v40, %v2131_v25 }
 0x1ad   : > { %4047 = vst.msk [vmem:[%s5986_s24 + $0xb8] sm:$0xff] %vm368_vm1, %v3221_v24 }
 0x1ae   : > { %4046 = vst.msk [vmem:[%s5986_s24 + $0xb0] sm:$0xff] %vm368_vm1, %v3220_v26  ;;  %v4627_v27 = vpop.f32.mrb[8].mxu1 }
 0x1af   : > { %v3223_v28 = vadd.f32 %v4627_v27, %v5982_v40  ;;  %v2141_v29 = vpop.f32.mrb[9].mxu1 }
 0x1b0   : > { %v3222_v30 = vadd.f32 %v5982_v40, %v2141_v29 }
 0x1b1   : > { %4049 = vst.msk [vmem:[%s5986_s24 + $0xc8] sm:$0xff] %vm368_vm1, %v3223_v28 }
 0x1b2   : > { %4048 = vst.msk [vmem:[%s5986_s24 + $0xc0] sm:$0xff] %vm368_vm1, %v3222_v30  ;;  %v4630_v31 = vpop.f32.mrb[10].mxu1 }
 0x1b3   : > { %v3225_v34 = vadd.f32 %v4630_v31, %v5982_v40  ;;  %v2151_v35 = vpop.f32.mrb[11].mxu1 }
 0x1b4   : > { %v3224_v52 = vadd.f32 %v5982_v40, %v2151_v35 }
 0x1b5   : > { %4051 = vst.msk [vmem:[%s5986_s24 + $0xd8] sm:$0xff] %vm368_vm1, %v3225_v34 }
 0x1b6   : > { %4050 = vst.msk [vmem:[%s5986_s24 + $0xd0] sm:$0xff] %vm368_vm1, %v3224_v52  ;;  %v4633_v53 = vpop.f32.mrb[12].mxu1 }
 0x1b7   : > { %v3227_v32 = vadd.f32 %v4633_v53, %v5982_v40  ;;  %v2161_v33 = vpop.f32.mrb[13].mxu1 }
 0x1b8   : > { %v3226_v36 = vadd.f32 %v5982_v40, %v2161_v33 }
 0x1b9   : > { %4053 = vst.msk [vmem:[%s5986_s24 + $0xe8] sm:$0xff] %vm368_vm1, %v3227_v32 }
 0x1ba   : > { %4052 = vst.msk [vmem:[%s5986_s24 + $0xe0] sm:$0xff] %vm368_vm1, %v3226_v36  ;;  %v4636_v37 = vpop.f32.mrb[14].mxu1 }
 0x1bb   : > { %v3229_v38 = vadd.f32 %v4636_v37, %v5982_v40  ;;  %v2171_v39 = vpop.f32.mrb[15].mxu1 }
 0x1bc   : > { %v3228_v41 = vadd.f32 %v5982_v40, %v2171_v39 }
 0x1bd   : > { %4055 = vst.msk [vmem:[%s5986_s24 + $0xf8] sm:$0xff] %vm368_vm1, %v3229_v38 }
 0x1be   : > { %4054 = vst.msk [vmem:[%s5986_s24 + $0xf0] sm:$0xff] %vm368_vm1, %v3228_v41 }
 0x1dd   : > { %v4771_v43 = vpop.f32.mrb[16].mxu0 }
 0x1de   : > { %v4719_v42 = vpop.f32.mrb[16].mxu1  ;;  %v3281_v45 = vadd.f32 %v4771_v43, %v5982_v40  ;;  %v3081_v47 = vpop.f32.mrb[17].mxu0  ;;  %v3482_v43 = vld [vmem:[%s5986_s24 + $0x8] sm:$0xff] (%p5171_p5) }
 0x1df   : > { %v3248_v44 = vadd.f32 %v4719_v42, %v5982_v40  ;;  %v2743_v46 = vpop.f32.mrb[17].mxu1  ;;  %v3280_v49 = vadd.f32 %v5982_v40, %v3081_v47  ;;  %v3490_v47 = vld [vmem:[%s5986_s24 + $0x28] sm:$0xff] (%p5171_p5)  ;;  %3483 = vst [vmem:[%s6194_s29 + $0x8] sm:$0xff] (%p5171_p5), %v3482_v43 }
 0x1e0   : > { %v3247_v48 = vadd.f32 %v5982_v40, %v2743_v46  ;;  %4073 = vst.msk [vmem:[%s5986_s24 + $0x188] sm:$0xff] %vm368_vm1, %v3281_v45  ;;  %v3486_v45 = vld [vmem:[%s5986_s24 + $0x18] sm:$0xff] (%p5171_p5)  ;;  %v3488_v46 = vld [vmem:[%s5986_s24 + $0x20] sm:$0xff] (%p5171_p5)  ;;  %3491 = vst [vmem:[%s6194_s29 + $0x28] sm:$0xff] (%p5171_p5), %v3490_v47 }
 0x1e1   : > { %4057 = vst.msk [vmem:[%s5986_s24 + $0x108] sm:$0xff] %vm368_vm1, %v3248_v44  ;;  %4072 = vst.msk [vmem:[%s5986_s24 + $0x180] sm:$0xff] %vm368_vm1, %v3280_v49  ;;  %v4774_v51 = vpop.f32.mrb[18].mxu0  ;;  %v3484_v44 = vld [vmem:[%s5986_s24 + $0x10] sm:$0xff] (%p5171_p5)  ;;  %v3494_v49 = vld [vmem:[%s5986_s24 + $0x38] sm:$0xff] (%p5171_p5) }
 0x1e2   : > { %4056 = vst.msk [vmem:[%s5986_s24 + $0x100] sm:$0xff] %vm368_vm1, %v3247_v48  ;;  %v4722_v50 = vpop.f32.mrb[18].mxu1  ;;  %v3283_v55 = vadd.f32 %v4774_v51, %v5982_v40  ;;  %v3091_v57 = vpop.f32.mrb[19].mxu0  ;;  %v3492_v48 = vld [vmem:[%s5986_s24 + $0x30] sm:$0xff] (%p5171_p5)  ;;  %v3498_v51 = vld [vmem:[%s5986_s24 + $0x48] sm:$0xff] (%p5171_p5)  ;;  %3485 = vst [vmem:[%s6194_s29 + $0x10] sm:$0xff] (%p5171_p5), %v3484_v44 }
 0x1e3   : > { %v3250_v54 = vadd.f32 %v4722_v50, %v5982_v40  ;;  %v2753_v56 = vpop.f32.mrb[19].mxu1  ;;  %v3282_v59 = vadd.f32 %v5982_v40, %v3091_v57  ;;  %v3496_v50 = vld [vmem:[%s5986_s24 + $0x40] sm:$0xff] (%p5171_p5)  ;;  %3487 = vst [vmem:[%s6194_s29 + $0x18] sm:$0xff] (%p5171_p5), %v3486_v45  ;;  %3489 = vst [vmem:[%s6194_s29 + $0x20] sm:$0xff] (%p5171_p5), %v3488_v46  ;;  %v3506_v57 = vld [vmem:[%s5986_s24 + $0x68] sm:$0xff] (%p5171_p5) }
 0x1e4   : > { %v3249_v58 = vadd.f32 %v5982_v40, %v2753_v56  ;;  %4075 = vst.msk [vmem:[%s5986_s24 + $0x198] sm:$0xff] %vm368_vm1, %v3283_v55  ;;  %v3502_v55 = vld [vmem:[%s5986_s24 + $0x58] sm:$0xff] (%p5171_p5)  ;;  %3493 = vst [vmem:[%s6194_s29 + $0x30] sm:$0xff] (%p5171_p5), %v3492_v48  ;;  %v3504_v56 = vld [vmem:[%s5986_s24 + $0x60] sm:$0xff] (%p5171_p5) }
 0x1e5   : > { %4059 = vst.msk [vmem:[%s5986_s24 + $0x118] sm:$0xff] %vm368_vm1, %v3250_v54  ;;  %4074 = vst.msk [vmem:[%s5986_s24 + $0x190] sm:$0xff] %vm368_vm1, %v3282_v59  ;;  %v4777_v61 = vpop.f32.mrb[20].mxu0  ;;  %v3500_v54 = vld [vmem:[%s5986_s24 + $0x50] sm:$0xff] (%p5171_p5)  ;;  %v3510_v59 = vld [vmem:[%s5986_s24 + $0x78] sm:$0xff] (%p5171_p5) }
 0x1e6   : > { %4058 = vst.msk [vmem:[%s5986_s24 + $0x110] sm:$0xff] %vm368_vm1, %v3249_v58  ;;  %v4725_v60 = vpop.f32.mrb[20].mxu1  ;;  %v3285_v63 = vadd.f32 %v4777_v61, %v5982_v40  ;;  %v3101_v1 = vpop.f32.mrb[21].mxu0  ;;  %3495 = vst [vmem:[%s6194_s29 + $0x38] sm:$0xff] (%p5171_p5), %v3494_v49  ;;  %v3508_v58 = vld [vmem:[%s5986_s24 + $0x70] sm:$0xff] (%p5171_p5)  ;;  %v3514_v61 = vld [vmem:[%s5986_s24 + $0x88] sm:$0xff] (%p5171_p5) }
 0x1e7   : > { %v3252_v62 = vadd.f32 %v4725_v60, %v5982_v40  ;;  %v2763_v0 = vpop.f32.mrb[21].mxu1  ;;  %v3284_v3 = vadd.f32 %v5982_v40, %v3101_v1  ;;  %3497 = vst [vmem:[%s6194_s29 + $0x40] sm:$0xff] (%p5171_p5), %v3496_v50  ;;  %3499 = vst [vmem:[%s6194_s29 + $0x48] sm:$0xff] (%p5171_p5), %v3498_v51  ;;  %v3512_v60 = vld [vmem:[%s5986_s24 + $0x80] sm:$0xff] (%p5171_p5)  ;;  %v3522_v1 = vld [vmem:[%s5986_s24 + $0xa8] sm:$0xff] (%p5171_p5) }
 0x1e8   : > { %v3251_v2 = vadd.f32 %v5982_v40, %v2763_v0  ;;  %4077 = vst.msk [vmem:[%s5986_s24 + $0x1a8] sm:$0xff] %vm368_vm1, %v3285_v63  ;;  %3501 = vst [vmem:[%s6194_s29 + $0x50] sm:$0xff] (%p5171_p5), %v3500_v54  ;;  %v3518_v63 = vld [vmem:[%s5986_s24 + $0x98] sm:$0xff] (%p5171_p5)  ;;  %v3520_v0 = vld [vmem:[%s5986_s24 + $0xa0] sm:$0xff] (%p5171_p5) }
 0x1e9   : > { %4061 = vst.msk [vmem:[%s5986_s24 + $0x128] sm:$0xff] %vm368_vm1, %v3252_v62  ;;  %4076 = vst.msk [vmem:[%s5986_s24 + $0x1a0] sm:$0xff] %vm368_vm1, %v3284_v3  ;;  %v4780_v5 = vpop.f32.mrb[22].mxu0  ;;  %v3516_v62 = vld [vmem:[%s5986_s24 + $0x90] sm:$0xff] (%p5171_p5)  ;;  %v3526_v3 = vld [vmem:[%s5986_s24 + $0xb8] sm:$0xff] (%p5171_p5) }
 0x1ea   : > { %4060 = vst.msk [vmem:[%s5986_s24 + $0x120] sm:$0xff] %vm368_vm1, %v3251_v2  ;;  %v4728_v4 = vpop.f32.mrb[22].mxu1  ;;  %v3287_v7 = vadd.f32 %v4780_v5, %v5982_v40  ;;  %v3111_v9 = vpop.f32.mrb[23].mxu0  ;;  %3503 = vst [vmem:[%s6194_s29 + $0x58] sm:$0xff] (%p5171_p5), %v3502_v55  ;;  %v3524_v2 = vld [vmem:[%s5986_s24 + $0xb0] sm:$0xff] (%p5171_p5)  ;;  %v3530_v5 = vld [vmem:[%s5986_s24 + $0xc8] sm:$0xff] (%p5171_p5) }
 0x1eb   : > { %v3254_v6 = vadd.f32 %v4728_v4, %v5982_v40  ;;  %v2773_v8 = vpop.f32.mrb[23].mxu1  ;;  %v3286_v11 = vadd.f32 %v5982_v40, %v3111_v9  ;;  %3505 = vst [vmem:[%s6194_s29 + $0x60] sm:$0xff] (%p5171_p5), %v3504_v56  ;;  %3507 = vst [vmem:[%s6194_s29 + $0x68] sm:$0xff] (%p5171_p5), %v3506_v57  ;;  %v3528_v4 = vld [vmem:[%s5986_s24 + $0xc0] sm:$0xff] (%p5171_p5)  ;;  %v3538_v9 = vld [vmem:[%s5986_s24 + $0xe8] sm:$0xff] (%p5171_p5) }
 0x1ec   : > { %v3253_v10 = vadd.f32 %v5982_v40, %v2773_v8  ;;  %4079 = vst.msk [vmem:[%s5986_s24 + $0x1b8] sm:$0xff] %vm368_vm1, %v3287_v7  ;;  %3509 = vst [vmem:[%s6194_s29 + $0x70] sm:$0xff] (%p5171_p5), %v3508_v58  ;;  %v3534_v7 = vld [vmem:[%s5986_s24 + $0xd8] sm:$0xff] (%p5171_p5)  ;;  %v3536_v8 = vld [vmem:[%s5986_s24 + $0xe0] sm:$0xff] (%p5171_p5) }
 0x1ed   : > { %4063 = vst.msk [vmem:[%s5986_s24 + $0x138] sm:$0xff] %vm368_vm1, %v3254_v6  ;;  %4078 = vst.msk [vmem:[%s5986_s24 + $0x1b0] sm:$0xff] %vm368_vm1, %v3286_v11  ;;  %v4783_v13 = vpop.f32.mrb[24].mxu0  ;;  %v3532_v6 = vld [vmem:[%s5986_s24 + $0xd0] sm:$0xff] (%p5171_p5)  ;;  %v3542_v11 = vld [vmem:[%s5986_s24 + $0xf8] sm:$0xff] (%p5171_p5) }
 0x1ee   : > { %4062 = vst.msk [vmem:[%s5986_s24 + $0x130] sm:$0xff] %vm368_vm1, %v3253_v10  ;;  %v4731_v12 = vpop.f32.mrb[24].mxu1  ;;  %v3289_v15 = vadd.f32 %v4783_v13, %v5982_v40  ;;  %v3121_v17 = vpop.f32.mrb[25].mxu0  ;;  %3511 = vst [vmem:[%s6194_s29 + $0x78] sm:$0xff] (%p5171_p5), %v3510_v59  ;;  %v3540_v10 = vld [vmem:[%s5986_s24 + $0xf0] sm:$0xff] (%p5171_p5)  ;;  %v3546_v13 = vld [vmem:[%s5986_s24 + $0x108] sm:$0xff] (%p5171_p5) }
 0x1ef   : > { %v3256_v14 = vadd.f32 %v4731_v12, %v5982_v40  ;;  %v2783_v16 = vpop.f32.mrb[25].mxu1  ;;  %v3288_v19 = vadd.f32 %v5982_v40, %v3121_v17  ;;  %3513 = vst [vmem:[%s6194_s29 + $0x100] sm:$0xff] (%p5171_p5), %v3512_v60  ;;  %3515 = vst [vmem:[%s6194_s29 + $0x108] sm:$0xff] (%p5171_p5), %v3514_v61  ;;  %v3544_v12 = vld [vmem:[%s5986_s24 + $0x100] sm:$0xff] (%p5171_p5) }
 0x1f0   : > { %v3255_v18 = vadd.f32 %v5982_v40, %v2783_v16  ;;  %4081 = vst.msk [vmem:[%s5986_s24 + $0x1c8] sm:$0xff] %vm368_vm1, %v3289_v15  ;;  %3517 = vst [vmem:[%s6194_s29 + $0x110] sm:$0xff] (%p5171_p5), %v3516_v62  ;;  %v3550_v15 = vld [vmem:[%s5986_s24 + $0x118] sm:$0xff] (%p5171_p5)  ;;  %v3554_v17 = vld [vmem:[%s5986_s24 + $0x128] sm:$0xff] (%p5171_p5) }
 0x1f1   : > { %4065 = vst.msk [vmem:[%s5986_s24 + $0x148] sm:$0xff] %vm368_vm1, %v3256_v14  ;;  %4080 = vst.msk [vmem:[%s5986_s24 + $0x1c0] sm:$0xff] %vm368_vm1, %v3288_v19  ;;  %v4786_v21 = vpop.f32.mrb[26].mxu0  ;;  %v3548_v14 = vld [vmem:[%s5986_s24 + $0x110] sm:$0xff] (%p5171_p5)  ;;  %v3552_v16 = vld [vmem:[%s5986_s24 + $0x120] sm:$0xff] (%p5171_p5) }
 0x1f2   : > { %4064 = vst.msk [vmem:[%s5986_s24 + $0x140] sm:$0xff] %vm368_vm1, %v3255_v18  ;;  %v4734_v20 = vpop.f32.mrb[26].mxu1  ;;  %v3291_v23 = vadd.f32 %v4786_v21, %v5982_v40  ;;  %v3131_v25 = vpop.f32.mrb[27].mxu0  ;;  %3519 = vst [vmem:[%s6194_s29 + $0x118] sm:$0xff] (%p5171_p5), %v3518_v63 }
 0x1f3   : > { %v3258_v22 = vadd.f32 %v4734_v20, %v5982_v40  ;;  %v2793_v24 = vpop.f32.mrb[27].mxu1  ;;  %v3290_v27 = vadd.f32 %v5982_v40, %v3131_v25  ;;  %3521 = vst [vmem:[%s6194_s29 + $0x120] sm:$0xff] (%p5171_p5), %v3520_v0  ;;  %3523 = vst [vmem:[%s6194_s29 + $0x128] sm:$0xff] (%p5171_p5), %v3522_v1 }
 0x1f4   : > { %v3257_v26 = vadd.f32 %v5982_v40, %v2793_v24  ;;  %4083 = vst.msk [vmem:[%s5986_s24 + $0x1d8] sm:$0xff] %vm368_vm1, %v3291_v23  ;;  %3525 = vst [vmem:[%s6194_s29 + $0x130] sm:$0xff] (%p5171_p5), %v3524_v2  ;;  %v3558_v19 = vld [vmem:[%s5986_s24 + $0x138] sm:$0xff] (%p5171_p5) }
 0x1f5   : > { %4067 = vst.msk [vmem:[%s5986_s24 + $0x158] sm:$0xff] %vm368_vm1, %v3258_v22  ;;  %4082 = vst.msk [vmem:[%s5986_s24 + $0x1d0] sm:$0xff] %vm368_vm1, %v3290_v27  ;;  %v4789_v29 = vpop.f32.mrb[28].mxu0  ;;  %v3556_v18 = vld [vmem:[%s5986_s24 + $0x130] sm:$0xff] (%p5171_p5) }
 0x1f6   : > { %4066 = vst.msk [vmem:[%s5986_s24 + $0x150] sm:$0xff] %vm368_vm1, %v3257_v26  ;;  %v4737_v28 = vpop.f32.mrb[28].mxu1  ;;  %v3293_v31 = vadd.f32 %v4789_v29, %v5982_v40  ;;  %v3141_v35 = vpop.f32.mrb[29].mxu0  ;;  %3527 = vst [vmem:[%s6194_s29 + $0x138] sm:$0xff] (%p5171_p5), %v3526_v3  ;;  %v3578_v29 = vld [vmem:[%s5986_s24 + $0x188] sm:$0xff] (%p5171_p5) }
 0x1f7   : > { %v3260_v30 = vadd.f32 %v4737_v28, %v5982_v40  ;;  %v2803_v34 = vpop.f32.mrb[29].mxu1  ;;  %v3292_v53 = vadd.f32 %v5982_v40, %v3141_v35  ;;  %3529 = vst [vmem:[%s6194_s29 + $0x140] sm:$0xff] (%p5171_p5), %v3528_v4  ;;  %3531 = vst [vmem:[%s6194_s29 + $0x148] sm:$0xff] (%p5171_p5), %v3530_v5  ;;  %v3576_v28 = vld [vmem:[%s5986_s24 + $0x180] sm:$0xff] (%p5171_p5)  ;;  %v3586_v35 = vld [vmem:[%s5986_s24 + $0x1a8] sm:$0xff] (%p5171_p5) }
 0x1f8   : > { %v3259_v52 = vadd.f32 %v5982_v40, %v2803_v34  ;;  %4085 = vst.msk [vmem:[%s5986_s24 + $0x1e8] sm:$0xff] %vm368_vm1, %v3293_v31  ;;  %3319 = sbr.rel (!%p5171_p5) target bundleno = 528 (0x210), region = 40  ;;  %3533 = vst [vmem:[%s6194_s29 + $0x150] sm:$0xff] (%p5171_p5), %v3532_v6  ;;  %v3562_v21 = vld [vmem:[%s5986_s24 + $0x148] sm:$0xff] (%p5171_p5)  ;;  %v3582_v31 = vld [vmem:[%s5986_s24 + $0x198] sm:$0xff] (%p5171_p5) }
 0x1f9   : > { %4069 = vst.msk [vmem:[%s5986_s24 + $0x168] sm:$0xff] %vm368_vm1, %v3260_v30  ;;  %4084 = vst.msk [vmem:[%s5986_s24 + $0x1e0] sm:$0xff] %vm368_vm1, %v3292_v53  ;;  %v4792_v33 = vpop.f32.mrb[30].mxu0  ;;  %v3560_v20 = vld [vmem:[%s5986_s24 + $0x140] sm:$0xff] (%p5171_p5)  ;;  %v3580_v30 = vld [vmem:[%s5986_s24 + $0x190] sm:$0xff] (%p5171_p5) }
 0x1fa   : > { %4068 = vst.msk [vmem:[%s5986_s24 + $0x160] sm:$0xff] %vm368_vm1, %v3259_v52  ;;  %v4740_v32 = vpop.f32.mrb[30].mxu1  ;;  %v3295_v37 = vadd.f32 %v4792_v33, %v5982_v40  ;;  %v3151_v39 = vpop.f32.mrb[31].mxu0  ;;  %3535 = vst [vmem:[%s6194_s29 + $0x158] sm:$0xff] (%p5171_p5), %v3534_v7  ;;  %v3584_v34 = vld [vmem:[%s5986_s24 + $0x1a0] sm:$0xff] (%p5171_p5)  ;;  %v3588_v52 = vld [vmem:[%s5986_s24 + $0x1b0] sm:$0xff] (%p5171_p5) }
 0x1fb   : > { %v3262_v36 = vadd.f32 %v4740_v32, %v5982_v40  ;;  %v2813_v38 = vpop.f32.mrb[31].mxu1  ;;  %v3294_v42 = vadd.f32 %v5982_v40, %v3151_v39  ;;  %3537 = vst [vmem:[%s6194_s29 + $0x160] sm:$0xff] (%p5171_p5), %v3536_v8  ;;  %3539 = vst [vmem:[%s6194_s29 + $0x168] sm:$0xff] (%p5171_p5), %v3538_v9  ;;  %v3590_v53 = vld [vmem:[%s5986_s24 + $0x1b8] sm:$0xff] (%p5171_p5)  ;;  %v3592_v32 = vld [vmem:[%s5986_s24 + $0x1c0] sm:$0xff] (%p5171_p5) }
 0x1fc   : > { %v3261_v41 = vadd.f32 %v5982_v40, %v2813_v38  ;;  %4087 = vst.msk [vmem:[%s5986_s24 + $0x1f8] sm:$0xff] %vm368_vm1, %v3295_v37  ;;  %v3480_v40 = vld [vmem:[%s5986_s24] sm:$0xff] (%p5171_p5)  ;;  %3541 = vst [vmem:[%s6194_s29 + $0x170] sm:$0xff] (%p5171_p5), %v3540_v10  ;;  %v3566_v23 = vld [vmem:[%s5986_s24 + $0x158] sm:$0xff] (%p5171_p5) }
 0x1fd   : > { %4071 = vst.msk [vmem:[%s5986_s24 + $0x178] sm:$0xff] %vm368_vm1, %v3262_v36  ;;  %4086 = vst.msk [vmem:[%s5986_s24 + $0x1f0] sm:$0xff] %vm368_vm1, %v3294_v42  ;;  %v3564_v22 = vld [vmem:[%s5986_s24 + $0x150] sm:$0xff] (%p5171_p5)  ;;  %v3594_v33 = vld [vmem:[%s5986_s24 + $0x1c8] sm:$0xff] (%p5171_p5) }
 0x1fe   : > { %4070 = vst.msk [vmem:[%s5986_s24 + $0x170] sm:$0xff] %vm368_vm1, %v3261_v41  ;;  %3481 = vst [vmem:[%s6194_s29] sm:$0xff] (%p5171_p5), %v3480_v40  ;;  %v3596_v36 = vld [vmem:[%s5986_s24 + $0x1d0] sm:$0xff] (%p5171_p5)  ;;  %v3598_v37 = vld [vmem:[%s5986_s24 + $0x1d8] sm:$0xff] (%p5171_p5) }
 0x1ff   : > { %3543 = vst [vmem:[%s6194_s29 + $0x178] sm:$0xff] %v3542_v11  ;;  %3545 = vst [vmem:[%s6194_s29 + $0x200] sm:$0xff] %v3544_v12  ;;  %v3602_v39 = vld [vmem:[%s5986_s24 + $0x1e8] sm:$0xff] }
 0x200   : > { %3547 = vst [vmem:[%s6194_s29 + $0x208] sm:$0xff] %v3546_v13  ;;  %3549 = vst [vmem:[%s6194_s29 + $0x210] sm:$0xff] %v3548_v14  ;;  %v3570_v25 = vld [vmem:[%s5986_s24 + $0x168] sm:$0xff]  ;;  %v3600_v38 = vld [vmem:[%s5986_s24 + $0x1e0] sm:$0xff] }
 0x201   : > { %3551 = vst [vmem:[%s6194_s29 + $0x218] sm:$0xff] %v3550_v15  ;;  %3553 = vst [vmem:[%s6194_s29 + $0x220] sm:$0xff] %v3552_v16  ;;  %v3568_v24 = vld [vmem:[%s5986_s24 + $0x160] sm:$0xff] }
 0x202   : > { %3555 = vst [vmem:[%s6194_s29 + $0x228] sm:$0xff] %v3554_v17  ;;  %3557 = vst [vmem:[%s6194_s29 + $0x230] sm:$0xff] %v3556_v18 }
 0x203   : > { %3559 = vst [vmem:[%s6194_s29 + $0x238] sm:$0xff] %v3558_v19  ;;  %3561 = vst [vmem:[%s6194_s29 + $0x240] sm:$0xff] %v3560_v20  ;;  %v3606_v42 = vld [vmem:[%s5986_s24 + $0x1f8] sm:$0xff] }
 0x204   : > { %3563 = vst [vmem:[%s6194_s29 + $0x248] sm:$0xff] %v3562_v21  ;;  %3565 = vst [vmem:[%s6194_s29 + $0x250] sm:$0xff] %v3564_v22  ;;  %v3574_v27 = vld [vmem:[%s5986_s24 + $0x178] sm:$0xff]  ;;  %v3604_v41 = vld [vmem:[%s5986_s24 + $0x1f0] sm:$0xff] }
 0x205   : > { %3567 = vst [vmem:[%s6194_s29 + $0x258] sm:$0xff] %v3566_v23  ;;  %3569 = vst [vmem:[%s6194_s29 + $0x260] sm:$0xff] %v3568_v24  ;;  %v3572_v26 = vld [vmem:[%s5986_s24 + $0x170] sm:$0xff] }
 0x206   : > { %3571 = vst [vmem:[%s6194_s29 + $0x268] sm:$0xff] %v3570_v25  ;;  %3573 = vst [vmem:[%s6194_s29 + $0x270] sm:$0xff] %v3572_v26 }
 0x207   : > { %3575 = vst [vmem:[%s6194_s29 + $0x278] sm:$0xff] %v3574_v27  ;;  %3577 = vst [vmem:[%s6194_s29 + $0x300] sm:$0xff] %v3576_v28 }
 0x208   : > { %3579 = vst [vmem:[%s6194_s29 + $0x308] sm:$0xff] %v3578_v29  ;;  %3581 = vst [vmem:[%s6194_s29 + $0x310] sm:$0xff] %v3580_v30 }
 0x209   : > { %3583 = vst [vmem:[%s6194_s29 + $0x318] sm:$0xff] %v3582_v31  ;;  %3585 = vst [vmem:[%s6194_s29 + $0x320] sm:$0xff] %v3584_v34 }
 0x20a   : > { %3587 = vst [vmem:[%s6194_s29 + $0x328] sm:$0xff] %v3586_v35  ;;  %3589 = vst [vmem:[%s6194_s29 + $0x330] sm:$0xff] %v3588_v52 }
 0x20b   : > { %3591 = vst [vmem:[%s6194_s29 + $0x338] sm:$0xff] %v3590_v53  ;;  %3593 = vst [vmem:[%s6194_s29 + $0x340] sm:$0xff] %v3592_v32 }
 0x20c   : > { %3595 = vst [vmem:[%s6194_s29 + $0x348] sm:$0xff] %v3594_v33  ;;  %3597 = vst [vmem:[%s6194_s29 + $0x350] sm:$0xff] %v3596_v36 }
 0x20d   : > { %3599 = vst [vmem:[%s6194_s29 + $0x358] sm:$0xff] %v3598_v37  ;;  %3601 = vst [vmem:[%s6194_s29 + $0x360] sm:$0xff] %v3600_v38 }
 0x20e   : > { %3603 = vst [vmem:[%s6194_s29 + $0x368] sm:$0xff] %v3602_v39  ;;  %3605 = vst [vmem:[%s6194_s29 + $0x370] sm:$0xff] %v3604_v41 }
 0x20f   : > { %3607 = vst [vmem:[%s6194_s29 + $0x378] sm:$0xff] %v3606_v42 }
 0x210 PF: > { %s14_s21 = sadd.s32 1, %s5098_s21   ;;  %s6343_s15 = smov %s5078_s16 }
 0x211   : > { %p11_p12 = scmp.ge.s32.totalorder %s14_s21, 6   ;;  %s6344_s16 = smov %s5182_s30 }
 0x212   : > { %s6345_s17 = smov %s5090_s19  ;;  %s6346_s18 = smov %s5094_s20 }
 0x213   : > { %s6347_s19 = smov %s6350_s22  ;;  %s6348_s20 = smov %s6354_s23 }
 0x214   :  { %13 = sbr.rel (!%p11_p12) target bundleno = 4 (0x4), region = 132 }

</bundles_post_ra>
